<compile_context>
chip_gen: v7x
topology: tpu7x:2x2x1
jax: 0.10.0
libtpu: 0.0.40
codegen_flags: <defaults>
</compile_context>

<pallas_src>
import jax
import jax.numpy as jnp
from jax.experimental import pallas as pl
from jax.experimental.pallas import tpu as pltpu


def _conv3x3_sigmoid_kernel(w_ref, b_ref, x_ref, o_ref, xp_ref):
    # w_ref : (3*3*C_in*C_out,) f32 in SMEM, flat HWIO layout (ky, kx, c_in, c_out)
    # b_ref : (C_out,)          f32 in SMEM
    # x_ref : (N, C_in, H, W)       VMEM (NCHW, W on the lane axis)
    # o_ref : (N, C_out, H, W)      VMEM (NCHW)
    # xp_ref: (N, C_in, H+2, W+2)   VMEM scratch (zero-padded input)
    N, C_in, H, W = x_ref.shape
    C_out = o_ref.shape[1]

    # Fused F.pad(x, (1,1,1,1)): zero the scratch, copy the input interior.
    xp_ref[...] = jnp.zeros_like(xp_ref)
    xp_ref[:, :, 1:H + 1, 1:W + 1] = x_ref[...].astype(xp_ref.dtype)

    # Hoist all scalar parameters out of the loops (SMEM -> sreg, loaded once).
    wvals = [w_ref[i] for i in range(3 * 3 * C_in * C_out)]
    bvals = [b_ref[o] for o in range(C_out)]

    xp = xp_ref[...]                                   # (N, C_in, H+2, W+2) f32

    # 3x3 conv as 9*C_in scalar-weighted FMAs per output channel (VPU path).
    accs = [jnp.zeros((N, H, W), jnp.float32) for _ in range(C_out)]
    for c in range(C_in):
        slab = xp[:, c]                                # (N, H+2, W+2)
        for kx in range(3):
            cols = slab[:, :, kx:kx + W]               # (N, H+2, W): lane shift
            for ky in range(3):
                window = cols[:, ky:ky + H, :]         # (N, H, W): sublane shift
                base = ((ky * 3 + kx) * C_in + c) * C_out
                for o in range(C_out):
                    accs[o] = accs[o] + wvals[base + o] * window

    outs = []
    for o in range(C_out):
        z = accs[o] + bvals[o]
        outs.append(0.5 * (jnp.tanh(0.5 * z) + 1.0))   # sigmoid via EUP tanh
    if C_out == 1:
        out = outs[0][:, None, :, :]                   # (N, 1, H, W), no relayout
    else:
        out = jnp.stack(outs, axis=1)
    o_ref[...] = out.astype(o_ref.dtype)


def get_confidence_pallas(x_nchw, weight_hwio, bias):
    """x_nchw: (N, C_in, H, W). weight_hwio: (3, 3, C_in, C_out). bias: (C_out,).

    Returns sigmoid(conv3x3(zero_pad(x, 1))) as (N, C_out, H, W), matching the
    PyTorch module (NCHW in, NCHW out). No wrapper-side transpose or pad ops.
    """
    N, C_in, H, W = x_nchw.shape
    C_out = weight_hwio.shape[-1]

    w_flat = weight_hwio.reshape(-1).astype(jnp.float32)   # (3*3*C_in*C_out,)
    b_flat = bias.reshape(-1).astype(jnp.float32)          # (C_out,)

    return pl.pallas_call(
        _conv3x3_sigmoid_kernel,
        out_shape=jax.ShapeDtypeStruct((N, C_out, H, W), x_nchw.dtype),
        grid_spec=pltpu.PrefetchScalarGridSpec(
            num_scalar_prefetch=0,
            grid=(1,),
            in_specs=[
                pl.BlockSpec(memory_space=pltpu.MemorySpace.SMEM),   # weights
                pl.BlockSpec(memory_space=pltpu.MemorySpace.SMEM),   # bias
                pl.BlockSpec((N, C_in, H, W), lambda i: (0, 0, 0, 0)),
            ],
            out_specs=pl.BlockSpec((N, C_out, H, W), lambda i: (0, 0, 0, 0)),
            scratch_shapes=[pltpu.VMEM((N, C_in, H + 2, W + 2), jnp.float32)],
        ),
        compiler_params=pltpu.CompilerParams(
            dimension_semantics=("arbitrary",),
        ),
    )(w_flat, b_flat, x_nchw)


def _reference(x_nchw, weight_hwio, bias):
    # Pure-JAX reference (same math as the PyTorch module).
    x_pad = jnp.pad(x_nchw, ((0, 0), (0, 0), (1, 1), (1, 1)))
    w_oihw = jnp.transpose(weight_hwio, (3, 2, 0, 1))
    y = jax.lax.conv_general_dilated(
        x_pad, w_oihw, window_strides=(1, 1), padding="VALID",
        dimension_numbers=("NCHW", "OIHW", "NCHW"),
    )
    y = y + bias.reshape(1, -1, 1, 1)
    return jax.nn.sigmoid(y)


if __name__ == "__main__":
    key = jax.random.PRNGKey(0)
    k_x, k_w, k_b = jax.random.split(key, 3)

    # Small shapes consistent with the module: batch=2, C_in=4, H=W=16, C_out=1.
    N, C_in, H, W, C_out = 2, 4, 16, 16, 1

    x = jax.random.normal(k_x, (N, C_in, H, W), dtype=jnp.float32)
    fan_in = C_in * 3 * 3
    bound = 1.0 / (fan_in ** 0.5)
    weight_hwio = jax.random.uniform(
        k_w, (3, 3, C_in, C_out), minval=-bound, maxval=bound, dtype=jnp.float32)
    bias = jax.random.uniform(
        k_b, (C_out,), minval=-bound, maxval=bound, dtype=jnp.float32)

    y = get_confidence_pallas(x, weight_hwio, bias)
    y = jax.block_until_ready(y)

    y_ref = _reference(x, weight_hwio, bias)
    assert y.shape == (N, C_out, H, W), y.shape
    max_err = float(jnp.max(jnp.abs(y - y_ref)))
    assert jnp.allclose(y, y_ref, atol=1e-5, rtol=1e-5), max_err

    print("KERNEL_OK")
</pallas_src>

<mosaic_0001>
module attributes {stable_mosaic.version = 11 : i64} {
  func.func @_conv3x3_sigmoid_kernel(%arg0: i32, %arg1: memref<36xf32, #tpu.memory_space<smem>>, %arg2: memref<1xf32, #tpu.memory_space<smem>>, %arg3: memref<2x4x16x16xf32, #tpu.memory_space<vmem>>, %arg4: memref<2x1x16x16xf32, #tpu.memory_space<vmem>>, %arg5: memref<2x4x18x18xf32, #tpu.memory_space<vmem>>) attributes {dimension_semantics = [#tpu.dimension_semantics<arbitrary>], iteration_bounds = array<i64: 1>, scalar_prefetch = 0 : i64, scratch_operands = 1 : i64, tpu.core_type = #tpu.core_type<tc>, window_params = [{transform_indices = @transform_0, window_bounds = array<i64: 36>}, {transform_indices = @transform_1, window_bounds = array<i64: 1>}, {pipeline_mode = #tpu.pipeline_mode<synchronous>, transform_indices = @transform_2, window_bounds = array<i64: 2, 4, 16, 16>}, {pipeline_mode = #tpu.pipeline_mode<synchronous>, transform_indices = @transform_3, window_bounds = array<i64: 2, 1, 16, 16>}]} {
    %cst = arith.constant 0.000000e+00 : f32
    %0 = vector.broadcast %cst : f32 to vector<2x4x18x18xf32>
    %c0 = arith.constant 0 : index
    %c0_0 = arith.constant 0 : index
    %c0_1 = arith.constant 0 : index
    %c0_2 = arith.constant 0 : index
    %1 = vector.load %arg5[%c0, %c0_0, %c0_1, %c0_2] : memref<2x4x18x18xf32, #tpu.memory_space<vmem>>, vector<2x4x18x18xf32>
    tpu.vector_store %arg5[%c0, %c0_0, %c0_1, %c0_2], %0 {strides = array<i32>} : memref<2x4x18x18xf32, #tpu.memory_space<vmem>>, vector<2x4x18x18xf32>,
    %c0_3 = arith.constant 0 : index
    %c0_4 = arith.constant 0 : index
    %c0_5 = arith.constant 0 : index
    %c0_6 = arith.constant 0 : index
    %2 = vector.load %arg3[%c0_3, %c0_4, %c0_5, %c0_6] : memref<2x4x16x16xf32, #tpu.memory_space<vmem>>, vector<2x4x16x16xf32>
    %c0_7 = arith.constant 0 : index
    %c0_8 = arith.constant 0 : index
    %c1 = arith.constant 1 : index
    %c1_9 = arith.constant 1 : index
    %3 = vector.load %arg5[%c0_7, %c0_8, %c1, %c1_9] : memref<2x4x18x18xf32, #tpu.memory_space<vmem>>, vector<2x4x16x16xf32>
    tpu.vector_store %arg5[%c0_7, %c0_8, %c1, %c1_9], %2 {strides = array<i32>} : memref<2x4x18x18xf32, #tpu.memory_space<vmem>>, vector<2x4x16x16xf32>,
    %c0_10 = arith.constant 0 : index
    %4 = memref.load %arg1[%c0_10] : memref<36xf32, #tpu.memory_space<smem>>
    %c1_11 = arith.constant 1 : index
    %5 = memref.load %arg1[%c1_11] : memref<36xf32, #tpu.memory_space<smem>>
    %c2 = arith.constant 2 : index
    %6 = memref.load %arg1[%c2] : memref<36xf32, #tpu.memory_space<smem>>
    %c3 = arith.constant 3 : index
    %7 = memref.load %arg1[%c3] : memref<36xf32, #tpu.memory_space<smem>>
    %c4 = arith.constant 4 : index
    %8 = memref.load %arg1[%c4] : memref<36xf32, #tpu.memory_space<smem>>
    %c5 = arith.constant 5 : index
    %9 = memref.load %arg1[%c5] : memref<36xf32, #tpu.memory_space<smem>>
    %c6 = arith.constant 6 : index
    %10 = memref.load %arg1[%c6] : memref<36xf32, #tpu.memory_space<smem>>
    %c7 = arith.constant 7 : index
    %11 = memref.load %arg1[%c7] : memref<36xf32, #tpu.memory_space<smem>>
    %c8 = arith.constant 8 : index
    %12 = memref.load %arg1[%c8] : memref<36xf32, #tpu.memory_space<smem>>
    %c9 = arith.constant 9 : index
    %13 = memref.load %arg1[%c9] : memref<36xf32, #tpu.memory_space<smem>>
    %c10 = arith.constant 10 : index
    %14 = memref.load %arg1[%c10] : memref<36xf32, #tpu.memory_space<smem>>
    %c11 = arith.constant 11 : index
    %15 = memref.load %arg1[%c11] : memref<36xf32, #tpu.memory_space<smem>>
    %c12 = arith.constant 12 : index
    %16 = memref.load %arg1[%c12] : memref<36xf32, #tpu.memory_space<smem>>
    %c13 = arith.constant 13 : index
    %17 = memref.load %arg1[%c13] : memref<36xf32, #tpu.memory_space<smem>>
    %c14 = arith.constant 14 : index
    %18 = memref.load %arg1[%c14] : memref<36xf32, #tpu.memory_space<smem>>
    %c15 = arith.constant 15 : index
    %19 = memref.load %arg1[%c15] : memref<36xf32, #tpu.memory_space<smem>>
    %c16 = arith.constant 16 : index
    %20 = memref.load %arg1[%c16] : memref<36xf32, #tpu.memory_space<smem>>
    %c17 = arith.constant 17 : index
    %21 = memref.load %arg1[%c17] : memref<36xf32, #tpu.memory_space<smem>>
    %c18 = arith.constant 18 : index
    %22 = memref.load %arg1[%c18] : memref<36xf32, #tpu.memory_space<smem>>
    %c19 = arith.constant 19 : index
    %23 = memref.load %arg1[%c19] : memref<36xf32, #tpu.memory_space<smem>>
    %c20 = arith.constant 20 : index
    %24 = memref.load %arg1[%c20] : memref<36xf32, #tpu.memory_space<smem>>
    %c21 = arith.constant 21 : index
    %25 = memref.load %arg1[%c21] : memref<36xf32, #tpu.memory_space<smem>>
    %c22 = arith.constant 22 : index
    %26 = memref.load %arg1[%c22] : memref<36xf32, #tpu.memory_space<smem>>
    %c23 = arith.constant 23 : index
    %27 = memref.load %arg1[%c23] : memref<36xf32, #tpu.memory_space<smem>>
    %c24 = arith.constant 24 : index
    %28 = memref.load %arg1[%c24] : memref<36xf32, #tpu.memory_space<smem>>
    %c25 = arith.constant 25 : index
    %29 = memref.load %arg1[%c25] : memref<36xf32, #tpu.memory_space<smem>>
    %c26 = arith.constant 26 : index
    %30 = memref.load %arg1[%c26] : memref<36xf32, #tpu.memory_space<smem>>
    %c27 = arith.constant 27 : index
    %31 = memref.load %arg1[%c27] : memref<36xf32, #tpu.memory_space<smem>>
    %c28 = arith.constant 28 : index
    %32 = memref.load %arg1[%c28] : memref<36xf32, #tpu.memory_space<smem>>
    %c29 = arith.constant 29 : index
    %33 = memref.load %arg1[%c29] : memref<36xf32, #tpu.memory_space<smem>>
    %c30 = arith.constant 30 : index
    %34 = memref.load %arg1[%c30] : memref<36xf32, #tpu.memory_space<smem>>
    %c31 = arith.constant 31 : index
    %35 = memref.load %arg1[%c31] : memref<36xf32, #tpu.memory_space<smem>>
    %c32 = arith.constant 32 : index
    %36 = memref.load %arg1[%c32] : memref<36xf32, #tpu.memory_space<smem>>
    %c33 = arith.constant 33 : index
    %37 = memref.load %arg1[%c33] : memref<36xf32, #tpu.memory_space<smem>>
    %c34 = arith.constant 34 : index
    %38 = memref.load %arg1[%c34] : memref<36xf32, #tpu.memory_space<smem>>
    %c35 = arith.constant 35 : index
    %39 = memref.load %arg1[%c35] : memref<36xf32, #tpu.memory_space<smem>>
    %c0_12 = arith.constant 0 : index
    %40 = memref.load %arg2[%c0_12] : memref<1xf32, #tpu.memory_space<smem>>
    %c0_13 = arith.constant 0 : index
    %c0_14 = arith.constant 0 : index
    %c0_15 = arith.constant 0 : index
    %c0_16 = arith.constant 0 : index
    %41 = vector.load %arg5[%c0_13, %c0_14, %c0_15, %c0_16] : memref<2x4x18x18xf32, #tpu.memory_space<vmem>>, vector<2x4x18x18xf32>
    %cst_17 = arith.constant 0.000000e+00 : f32
    %42 = vector.broadcast %cst_17 : f32 to vector<2x16x16xf32>
    %43 = vector.extract_strided_slice %41 {offsets = [0, 0, 0, 0], sizes = [2, 1, 18, 18], strides = [1, 1, 1, 1]} : vector<2x4x18x18xf32> to vector<2x1x18x18xf32>
    %44 = vector.shape_cast %43 : vector<2x1x18x18xf32> to vector<2x18x18xf32>
    %45 = vector.extract_strided_slice %44 {offsets = [0, 0, 0], sizes = [2, 18, 16], strides = [1, 1, 1]} : vector<2x18x18xf32> to vector<2x18x16xf32>
    %46 = vector.extract_strided_slice %45 {offsets = [0, 0, 0], sizes = [2, 16, 16], strides = [1, 1, 1]} : vector<2x18x16xf32> to vector<2x16x16xf32>
    %47 = vector.broadcast %4 : f32 to vector<2x16x16xf32>
    %48 = arith.mulf %47, %46 : vector<2x16x16xf32>
    %49 = arith.addf %42, %48 : vector<2x16x16xf32>
    %50 = vector.extract_strided_slice %45 {offsets = [0, 1, 0], sizes = [2, 16, 16], strides = [1, 1, 1]} : vector<2x18x16xf32> to vector<2x16x16xf32>
    %51 = vector.broadcast %16 : f32 to vector<2x16x16xf32>
    %52 = arith.mulf %51, %50 : vector<2x16x16xf32>
    %53 = arith.addf %49, %52 : vector<2x16x16xf32>
    %54 = vector.extract_strided_slice %45 {offsets = [0, 2, 0], sizes = [2, 16, 16], strides = [1, 1, 1]} : vector<2x18x16xf32> to vector<2x16x16xf32>
    %55 = vector.broadcast %28 : f32 to vector<2x16x16xf32>
    %56 = arith.mulf %55, %54 : vector<2x16x16xf32>
    %57 = arith.addf %53, %56 : vector<2x16x16xf32>
    %58 = vector.extract_strided_slice %44 {offsets = [0, 0, 1], sizes = [2, 18, 16], strides = [1, 1, 1]} : vector<2x18x18xf32> to vector<2x18x16xf32>
    %59 = vector.extract_strided_slice %58 {offsets = [0, 0, 0], sizes = [2, 16, 16], strides = [1, 1, 1]} : vector<2x18x16xf32> to vector<2x16x16xf32>
    %60 = vector.broadcast %8 : f32 to vector<2x16x16xf32>
    %61 = arith.mulf %60, %59 : vector<2x16x16xf32>
    %62 = arith.addf %57, %61 : vector<2x16x16xf32>
    %63 = vector.extract_strided_slice %58 {offsets = [0, 1, 0], sizes = [2, 16, 16], strides = [1, 1, 1]} : vector<2x18x16xf32> to vector<2x16x16xf32>
    %64 = vector.broadcast %20 : f32 to vector<2x16x16xf32>
    %65 = arith.mulf %64, %63 : vector<2x16x16xf32>
    %66 = arith.addf %62, %65 : vector<2x16x16xf32>
    %67 = vector.extract_strided_slice %58 {offsets = [0, 2, 0], sizes = [2, 16, 16], strides = [1, 1, 1]} : vector<2x18x16xf32> to vector<2x16x16xf32>
    %68 = vector.broadcast %32 : f32 to vector<2x16x16xf32>
    %69 = arith.mulf %68, %67 : vector<2x16x16xf32>
    %70 = arith.addf %66, %69 : vector<2x16x16xf32>
    %71 = vector.extract_strided_slice %44 {offsets = [0, 0, 2], sizes = [2, 18, 16], strides = [1, 1, 1]} : vector<2x18x18xf32> to vector<2x18x16xf32>
    %72 = vector.extract_strided_slice %71 {offsets = [0, 0, 0], sizes = [2, 16, 16], strides = [1, 1, 1]} : vector<2x18x16xf32> to vector<2x16x16xf32>
    %73 = vector.broadcast %12 : f32 to vector<2x16x16xf32>
    %74 = arith.mulf %73, %72 : vector<2x16x16xf32>
    %75 = arith.addf %70, %74 : vector<2x16x16xf32>
    %76 = vector.extract_strided_slice %71 {offsets = [0, 1, 0], sizes = [2, 16, 16], strides = [1, 1, 1]} : vector<2x18x16xf32> to vector<2x16x16xf32>
    %77 = vector.broadcast %24 : f32 to vector<2x16x16xf32>
    %78 = arith.mulf %77, %76 : vector<2x16x16xf32>
    %79 = arith.addf %75, %78 : vector<2x16x16xf32>
    %80 = vector.extract_strided_slice %71 {offsets = [0, 2, 0], sizes = [2, 16, 16], strides = [1, 1, 1]} : vector<2x18x16xf32> to vector<2x16x16xf32>
    %81 = vector.broadcast %36 : f32 to vector<2x16x16xf32>
    %82 = arith.mulf %81, %80 : vector<2x16x16xf32>
    %83 = arith.addf %79, %82 : vector<2x16x16xf32>
    %84 = vector.extract_strided_slice %41 {offsets = [0, 1, 0, 0], sizes = [2, 1, 18, 18], strides = [1, 1, 1, 1]} : vector<2x4x18x18xf32> to vector<2x1x18x18xf32>
    %85 = vector.shape_cast %84 : vector<2x1x18x18xf32> to vector<2x18x18xf32>
    %86 = vector.extract_strided_slice %85 {offsets = [0, 0, 0], sizes = [2, 18, 16], strides = [1, 1, 1]} : vector<2x18x18xf32> to vector<2x18x16xf32>
    %87 = vector.extract_strided_slice %86 {offsets = [0, 0, 0], sizes = [2, 16, 16], strides = [1, 1, 1]} : vector<2x18x16xf32> to vector<2x16x16xf32>
    %88 = vector.broadcast %5 : f32 to vector<2x16x16xf32>
    %89 = arith.mulf %88, %87 : vector<2x16x16xf32>
    %90 = arith.addf %83, %89 : vector<2x16x16xf32>
    %91 = vector.extract_strided_slice %86 {offsets = [0, 1, 0], sizes = [2, 16, 16], strides = [1, 1, 1]} : vector<2x18x16xf32> to vector<2x16x16xf32>
    %92 = vector.broadcast %17 : f32 to vector<2x16x16xf32>
    %93 = arith.mulf %92, %91 : vector<2x16x16xf32>
    %94 = arith.addf %90, %93 : vector<2x16x16xf32>
    %95 = vector.extract_strided_slice %86 {offsets = [0, 2, 0], sizes = [2, 16, 16], strides = [1, 1, 1]} : vector<2x18x16xf32> to vector<2x16x16xf32>
    %96 = vector.broadcast %29 : f32 to vector<2x16x16xf32>
    %97 = arith.mulf %96, %95 : vector<2x16x16xf32>
    %98 = arith.addf %94, %97 : vector<2x16x16xf32>
    %99 = vector.extract_strided_slice %85 {offsets = [0, 0, 1], sizes = [2, 18, 16], strides = [1, 1, 1]} : vector<2x18x18xf32> to vector<2x18x16xf32>
    %100 = vector.extract_strided_slice %99 {offsets = [0, 0, 0], sizes = [2, 16, 16], strides = [1, 1, 1]} : vector<2x18x16xf32> to vector<2x16x16xf32>
    %101 = vector.broadcast %9 : f32 to vector<2x16x16xf32>
    %102 = arith.mulf %101, %100 : vector<2x16x16xf32>
    %103 = arith.addf %98, %102 : vector<2x16x16xf32>
    %104 = vector.extract_strided_slice %99 {offsets = [0, 1, 0], sizes = [2, 16, 16], strides = [1, 1, 1]} : vector<2x18x16xf32> to vector<2x16x16xf32>
    %105 = vector.broadcast %21 : f32 to vector<2x16x16xf32>
    %106 = arith.mulf %105, %104 : vector<2x16x16xf32>
    %107 = arith.addf %103, %106 : vector<2x16x16xf32>
    %108 = vector.extract_strided_slice %99 {offsets = [0, 2, 0], sizes = [2, 16, 16], strides = [1, 1, 1]} : vector<2x18x16xf32> to vector<2x16x16xf32>
    %109 = vector.broadcast %33 : f32 to vector<2x16x16xf32>
    %110 = arith.mulf %109, %108 : vector<2x16x16xf32>
    %111 = arith.addf %107, %110 : vector<2x16x16xf32>
    %112 = vector.extract_strided_slice %85 {offsets = [0, 0, 2], sizes = [2, 18, 16], strides = [1, 1, 1]} : vector<2x18x18xf32> to vector<2x18x16xf32>
    %113 = vector.extract_strided_slice %112 {offsets = [0, 0, 0], sizes = [2, 16, 16], strides = [1, 1, 1]} : vector<2x18x16xf32> to vector<2x16x16xf32>
    %114 = vector.broadcast %13 : f32 to vector<2x16x16xf32>
    %115 = arith.mulf %114, %113 : vector<2x16x16xf32>
    %116 = arith.addf %111, %115 : vector<2x16x16xf32>
    %117 = vector.extract_strided_slice %112 {offsets = [0, 1, 0], sizes = [2, 16, 16], strides = [1, 1, 1]} : vector<2x18x16xf32> to vector<2x16x16xf32>
    %118 = vector.broadcast %25 : f32 to vector<2x16x16xf32>
    %119 = arith.mulf %118, %117 : vector<2x16x16xf32>
    %120 = arith.addf %116, %119 : vector<2x16x16xf32>
    %121 = vector.extract_strided_slice %112 {offsets = [0, 2, 0], sizes = [2, 16, 16], strides = [1, 1, 1]} : vector<2x18x16xf32> to vector<2x16x16xf32>
    %122 = vector.broadcast %37 : f32 to vector<2x16x16xf32>
    %123 = arith.mulf %122, %121 : vector<2x16x16xf32>
    %124 = arith.addf %120, %123 : vector<2x16x16xf32>
    %125 = vector.extract_strided_slice %41 {offsets = [0, 2, 0, 0], sizes = [2, 1, 18, 18], strides = [1, 1, 1, 1]} : vector<2x4x18x18xf32> to vector<2x1x18x18xf32>
    %126 = vector.shape_cast %125 : vector<2x1x18x18xf32> to vector<2x18x18xf32>
    %127 = vector.extract_strided_slice %126 {offsets = [0, 0, 0], sizes = [2, 18, 16], strides = [1, 1, 1]} : vector<2x18x18xf32> to vector<2x18x16xf32>
    %128 = vector.extract_strided_slice %127 {offsets = [0, 0, 0], sizes = [2, 16, 16], strides = [1, 1, 1]} : vector<2x18x16xf32> to vector<2x16x16xf32>
    %129 = vector.broadcast %6 : f32 to vector<2x16x16xf32>
    %130 = arith.mulf %129, %128 : vector<2x16x16xf32>
    %131 = arith.addf %124, %130 : vector<2x16x16xf32>
    %132 = vector.extract_strided_slice %127 {offsets = [0, 1, 0], sizes = [2, 16, 16], strides = [1, 1, 1]} : vector<2x18x16xf32> to vector<2x16x16xf32>
    %133 = vector.broadcast %18 : f32 to vector<2x16x16xf32>
    %134 = arith.mulf %133, %132 : vector<2x16x16xf32>
    %135 = arith.addf %131, %134 : vector<2x16x16xf32>
    %136 = vector.extract_strided_slice %127 {offsets = [0, 2, 0], sizes = [2, 16, 16], strides = [1, 1, 1]} : vector<2x18x16xf32> to vector<2x16x16xf32>
    %137 = vector.broadcast %30 : f32 to vector<2x16x16xf32>
    %138 = arith.mulf %137, %136 : vector<2x16x16xf32>
    %139 = arith.addf %135, %138 : vector<2x16x16xf32>
    %140 = vector.extract_strided_slice %126 {offsets = [0, 0, 1], sizes = [2, 18, 16], strides = [1, 1, 1]} : vector<2x18x18xf32> to vector<2x18x16xf32>
    %141 = vector.extract_strided_slice %140 {offsets = [0, 0, 0], sizes = [2, 16, 16], strides = [1, 1, 1]} : vector<2x18x16xf32> to vector<2x16x16xf32>
    %142 = vector.broadcast %10 : f32 to vector<2x16x16xf32>
    %143 = arith.mulf %142, %141 : vector<2x16x16xf32>
    %144 = arith.addf %139, %143 : vector<2x16x16xf32>
    %145 = vector.extract_strided_slice %140 {offsets = [0, 1, 0], sizes = [2, 16, 16], strides = [1, 1, 1]} : vector<2x18x16xf32> to vector<2x16x16xf32>
    %146 = vector.broadcast %22 : f32 to vector<2x16x16xf32>
    %147 = arith.mulf %146, %145 : vector<2x16x16xf32>
    %148 = arith.addf %144, %147 : vector<2x16x16xf32>
    %149 = vector.extract_strided_slice %140 {offsets = [0, 2, 0], sizes = [2, 16, 16], strides = [1, 1, 1]} : vector<2x18x16xf32> to vector<2x16x16xf32>
    %150 = vector.broadcast %34 : f32 to vector<2x16x16xf32>
    %151 = arith.mulf %150, %149 : vector<2x16x16xf32>
    %152 = arith.addf %148, %151 : vector<2x16x16xf32>
    %153 = vector.extract_strided_slice %126 {offsets = [0, 0, 2], sizes = [2, 18, 16], strides = [1, 1, 1]} : vector<2x18x18xf32> to vector<2x18x16xf32>
    %154 = vector.extract_strided_slice %153 {offsets = [0, 0, 0], sizes = [2, 16, 16], strides = [1, 1, 1]} : vector<2x18x16xf32> to vector<2x16x16xf32>
    %155 = vector.broadcast %14 : f32 to vector<2x16x16xf32>
    %156 = arith.mulf %155, %154 : vector<2x16x16xf32>
    %157 = arith.addf %152, %156 : vector<2x16x16xf32>
    %158 = vector.extract_strided_slice %153 {offsets = [0, 1, 0], sizes = [2, 16, 16], strides = [1, 1, 1]} : vector<2x18x16xf32> to vector<2x16x16xf32>
    %159 = vector.broadcast %26 : f32 to vector<2x16x16xf32>
    %160 = arith.mulf %159, %158 : vector<2x16x16xf32>
    %161 = arith.addf %157, %160 : vector<2x16x16xf32>
    %162 = vector.extract_strided_slice %153 {offsets = [0, 2, 0], sizes = [2, 16, 16], strides = [1, 1, 1]} : vector<2x18x16xf32> to vector<2x16x16xf32>
    %163 = vector.broadcast %38 : f32 to vector<2x16x16xf32>
    %164 = arith.mulf %163, %162 : vector<2x16x16xf32>
    %165 = arith.addf %161, %164 : vector<2x16x16xf32>
    %166 = vector.extract_strided_slice %41 {offsets = [0, 3, 0, 0], sizes = [2, 1, 18, 18], strides = [1, 1, 1, 1]} : vector<2x4x18x18xf32> to vector<2x1x18x18xf32>
    %167 = vector.shape_cast %166 : vector<2x1x18x18xf32> to vector<2x18x18xf32>
    %168 = vector.extract_strided_slice %167 {offsets = [0, 0, 0], sizes = [2, 18, 16], strides = [1, 1, 1]} : vector<2x18x18xf32> to vector<2x18x16xf32>
    %169 = vector.extract_strided_slice %168 {offsets = [0, 0, 0], sizes = [2, 16, 16], strides = [1, 1, 1]} : vector<2x18x16xf32> to vector<2x16x16xf32>
    %170 = vector.broadcast %7 : f32 to vector<2x16x16xf32>
    %171 = arith.mulf %170, %169 : vector<2x16x16xf32>
    %172 = arith.addf %165, %171 : vector<2x16x16xf32>
    %173 = vector.extract_strided_slice %168 {offsets = [0, 1, 0], sizes = [2, 16, 16], strides = [1, 1, 1]} : vector<2x18x16xf32> to vector<2x16x16xf32>
    %174 = vector.broadcast %19 : f32 to vector<2x16x16xf32>
    %175 = arith.mulf %174, %173 : vector<2x16x16xf32>
    %176 = arith.addf %172, %175 : vector<2x16x16xf32>
    %177 = vector.extract_strided_slice %168 {offsets = [0, 2, 0], sizes = [2, 16, 16], strides = [1, 1, 1]} : vector<2x18x16xf32> to vector<2x16x16xf32>
    %178 = vector.broadcast %31 : f32 to vector<2x16x16xf32>
    %179 = arith.mulf %178, %177 : vector<2x16x16xf32>
    %180 = arith.addf %176, %179 : vector<2x16x16xf32>
    %181 = vector.extract_strided_slice %167 {offsets = [0, 0, 1], sizes = [2, 18, 16], strides = [1, 1, 1]} : vector<2x18x18xf32> to vector<2x18x16xf32>
    %182 = vector.extract_strided_slice %181 {offsets = [0, 0, 0], sizes = [2, 16, 16], strides = [1, 1, 1]} : vector<2x18x16xf32> to vector<2x16x16xf32>
    %183 = vector.broadcast %11 : f32 to vector<2x16x16xf32>
    %184 = arith.mulf %183, %182 : vector<2x16x16xf32>
    %185 = arith.addf %180, %184 : vector<2x16x16xf32>
    %186 = vector.extract_strided_slice %181 {offsets = [0, 1, 0], sizes = [2, 16, 16], strides = [1, 1, 1]} : vector<2x18x16xf32> to vector<2x16x16xf32>
    %187 = vector.broadcast %23 : f32 to vector<2x16x16xf32>
    %188 = arith.mulf %187, %186 : vector<2x16x16xf32>
    %189 = arith.addf %185, %188 : vector<2x16x16xf32>
    %190 = vector.extract_strided_slice %181 {offsets = [0, 2, 0], sizes = [2, 16, 16], strides = [1, 1, 1]} : vector<2x18x16xf32> to vector<2x16x16xf32>
    %191 = vector.broadcast %35 : f32 to vector<2x16x16xf32>
    %192 = arith.mulf %191, %190 : vector<2x16x16xf32>
    %193 = arith.addf %189, %192 : vector<2x16x16xf32>
    %194 = vector.extract_strided_slice %167 {offsets = [0, 0, 2], sizes = [2, 18, 16], strides = [1, 1, 1]} : vector<2x18x18xf32> to vector<2x18x16xf32>
    %195 = vector.extract_strided_slice %194 {offsets = [0, 0, 0], sizes = [2, 16, 16], strides = [1, 1, 1]} : vector<2x18x16xf32> to vector<2x16x16xf32>
    %196 = vector.broadcast %15 : f32 to vector<2x16x16xf32>
    %197 = arith.mulf %196, %195 : vector<2x16x16xf32>
    %198 = arith.addf %193, %197 : vector<2x16x16xf32>
    %199 = vector.extract_strided_slice %194 {offsets = [0, 1, 0], sizes = [2, 16, 16], strides = [1, 1, 1]} : vector<2x18x16xf32> to vector<2x16x16xf32>
    %200 = vector.broadcast %27 : f32 to vector<2x16x16xf32>
    %201 = arith.mulf %200, %199 : vector<2x16x16xf32>
    %202 = arith.addf %198, %201 : vector<2x16x16xf32>
    %203 = vector.extract_strided_slice %194 {offsets = [0, 2, 0], sizes = [2, 16, 16], strides = [1, 1, 1]} : vector<2x18x16xf32> to vector<2x16x16xf32>
    %204 = vector.broadcast %39 : f32 to vector<2x16x16xf32>
    %205 = arith.mulf %204, %203 : vector<2x16x16xf32>
    %206 = arith.addf %202, %205 : vector<2x16x16xf32>
    %207 = vector.broadcast %40 : f32 to vector<2x16x16xf32>
    %208 = arith.addf %206, %207 : vector<2x16x16xf32>
    %cst_18 = arith.constant 5.000000e-01 : f32
    %209 = vector.broadcast %cst_18 : f32 to vector<2x16x16xf32>
    %210 = arith.mulf %209, %208 : vector<2x16x16xf32>
    %211 = math.tanh %210 : vector<2x16x16xf32>
    %cst_19 = arith.constant 1.000000e+00 : f32
    %212 = vector.broadcast %cst_19 : f32 to vector<2x16x16xf32>
    %213 = arith.addf %211, %212 : vector<2x16x16xf32>
    %cst_20 = arith.constant 5.000000e-01 : f32
    %214 = vector.broadcast %cst_20 : f32 to vector<2x16x16xf32>
    %215 = arith.mulf %214, %213 : vector<2x16x16xf32>
    %216 = vector.shape_cast %215 : vector<2x16x16xf32> to vector<2x1x16x16xf32>
    %c0_21 = arith.constant 0 : index
    %c0_22 = arith.constant 0 : index
    %c0_23 = arith.constant 0 : index
    %c0_24 = arith.constant 0 : index
    %217 = vector.load %arg4[%c0_21, %c0_22, %c0_23, %c0_24] : memref<2x1x16x16xf32, #tpu.memory_space<vmem>>, vector<2x1x16x16xf32>
    tpu.vector_store %arg4[%c0_21, %c0_22, %c0_23, %c0_24], %216 {strides = array<i32>} : memref<2x1x16x16xf32, #tpu.memory_space<vmem>>, vector<2x1x16x16xf32>,
    return
  }
  func.func @transform_0(%arg0: i32) -> i32 {
    %c0_i32 = arith.constant 0 : i32
    %c0_i32_0 = arith.constant 0 : i32
    return %c0_i32 : i32
  }
  func.func @transform_1(%arg0: i32) -> i32 {
    %c0_i32 = arith.constant 0 : i32
    %c0_i32_0 = arith.constant 0 : i32
    return %c0_i32 : i32
  }
  func.func @transform_2(%arg0: i32) -> (i32, i32, i32, i32) {
    %c0_i32 = arith.constant 0 : i32
    %c0_i32_0 = arith.constant 0 : i32
    %c0_i32_1 = arith.constant 0 : i32
    %c0_i32_2 = arith.constant 0 : i32
    %c0_i32_3 = arith.constant 0 : i32
    return %c0_i32, %c0_i32_0, %c0_i32_1, %c0_i32_2 : i32, i32, i32, i32
  }
  func.func @transform_3(%arg0: i32) -> (i32, i32, i32, i32) {
    %c0_i32 = arith.constant 0 : i32
    %c0_i32_0 = arith.constant 0 : i32
    %c0_i32_1 = arith.constant 0 : i32
    %c0_i32_2 = arith.constant 0 : i32
    %c0_i32_3 = arith.constant 0 : i32
    return %c0_i32, %c0_i32_0, %c0_i32_1, %c0_i32_2 : i32, i32, i32, i32
  }
}

</mosaic_0001>

<bundles_post_ra>
// kernel: tpu_custom_call.1
= control target key start
LH: loop header
LB: loop body
LE: loop exit
PB: predicated region body
PF: predicated region fallthrough
CT: control target
= control target key end

     0   :  { %9 = vsyncpa [#allocation7], 0  ;;  %s2303_s0 = inlined_call_operand.vmem [shape: f32[36], index: 0, kind: input, shape index: {}]   ;;  %s2304_s1 = inlined_call_operand.<no memory space> [shape: f32[1], index: 1, kind: input, shape index: {}]   ;;  %s2305_s2 = inlined_call_operand.hbm [shape: f32[2,4,16,16], index: 2, kind: input, shape index: {}]   ;;  %s2306_s3 = inlined_call_operand.hbm [shape: f32[2,1,16,16], index: 3, kind: output, shape index: {}]  }
   0x1   :  { %10 = vsyncpa [#allocation5], 0 }
   0x2   :  { %11 = vsyncpa [#allocation6], 0  ;;  %s18_s14 = sshll.u32 %s2303_s0, 4  ;;  %s19_s14 = int_to_ptr.vmem [resolvable:$true] %s18_s14 }
   0x3   :  { %s1439_s15 = scalar_lea.vmem %s19_s14, 16  ;;  %p1444_p1 = scmp.lt.s32.totalorder %s19_s14, %s19_s14 }
   0x4   :  { %p1440_p0 = scmp.ne.s32.totalorder %s19_s14, %s1439_s15  ;;  %p1445_p2 = scmp.lt.s32.totalorder %s1439_s15, %s1439_s15 }
   0x6   :  { %p1446_p3 = por %p1445_p2, %p1444_p1 }
   0x8   :  { %p1447_p4 = pnand %p1446_p3, %p1440_p0 }
   0xa   :  { %1450 = shalt.err (!%p1447_p4)
}
   0xb   :  { %s1501_s16 = smov [#allocation4]   ;;  %s1502_s17 = smov [#allocation8]  }
   0xc   :  { %21 = dma.vmem_to_smem %s19_s14, 16, %s1501_s16, [#allocation7]  }
   0xd   :  { %s29_s18 = sshll.u32 %s1502_s17, 4  ;;  %s1451_s21 = scalar_lea.hbm %s2305_s2, 2048  ;;  %s30_s18 = int_to_ptr.vmem [resolvable:$true] %s29_s18 }
   0xe   :  { %p1452_p5 = scmp.ne.s32.totalorder %s2305_s2, %s1451_s21  ;;  %p1455_p6 = scmp.lt.u32.totalorder %s1451_s21, %s2305_s2 }
  0x10   :  { %p1457_p7 = pnand %p1455_p6, %p1452_p5 }
  0x12   :  { %1460 = shalt.err (!%p1457_p7)
}
  0x13   :  { %s1461_s25 = scalar_lea.vmem %s30_s18, 2048  ;;  %p1466_p9 = scmp.lt.s32.totalorder %s30_s18, %s30_s18 }
  0x14   :  { %p1462_p8 = scmp.ne.s32.totalorder %s30_s18, %s1461_s25  ;;  %p1467_p10 = scmp.lt.s32.totalorder %s1461_s25, %s1461_s25 }
  0x16   :  { %p1468_p11 = por %p1467_p10, %p1466_p9 }
  0x18   :  { %p1469_p12 = pnand %p1468_p11, %p1462_p8 }
  0x1a   :  { %1472 = shalt.err (!%p1469_p12)
}
  0x1b   :  { %s1503_s26 = smov 128   ;;  %s1504_s27 = smov 8  }
  0x1c   :  { %35 = dma.hbm_to_vmem [thread:$0]  %s2305_s2, 2048, %s30_s18, [#allocation5], %s1503_s26, %s1503_s26, %s1504_s27  }
  0x1d   :  { %1495 = dma.done.wait [#allocation7], 16  }
  0x1e   :  { %1496 = vsyncadd [#allocation7], 4294967280 }
  0x1f   :  { %1497 = dma.done.wait [#allocation5], 2048  }
  0x20   :  { %1498 = vsyncadd [#allocation5], 4294965248 }
  0x21   :  { %42 = sfence }
  0x22   :  { %v71_v0 = vld [vmem:[#allocation8 + $0x10] sm:$0xff]  ;;  %v69_v1 = vld [vmem:[#allocation8] sm:$0xff]  ;;  %vm43_vm0 = vcmask 146432   ;;  %s1505_s30 = smov 1   ;;  %vm46_vm1 = vcmask 140288   ;;  %v72_v2 = vld [vmem:[#allocation8 + $0x18] sm:$0xff] }
  0x23   :  { %105 = vrot.lane.b32.xlu1 %v71_v0, %s1505_s30  ;;  %101 = vrot.lane.b32.xlu0 %v69_v1, %s1505_s30  ;;  %v70_v3 = vld [vmem:[#allocation8 + $0x8] sm:$0xff]  ;;  %v1506_v4 = vmov 0.0   ;;  %v73_v6 = vld [vmem:[#allocation8 + $0x20] sm:$0xff]  ;;  %v76_v9 = vld [vmem:[#allocation8 + $0x38] sm:$0xff]  ;;  %vm149_vm2 = vcmask 138248   ;;  %s1384_s2 = sld [smem:[#allocation4 + $0x4]] }
  0x24   :  { %48 = vst.msk [vmem:[#allocation2 + $0x18] sm:$0xff] %vm43_vm0, %v1506_v4  ;;  %49 = vst.msk [vmem:[#allocation2 + $0x20] sm:$0xff] %vm43_vm0, %v1506_v4  ;;  %v74_v5 = vld [vmem:[#allocation8 + $0x28] sm:$0xff]  ;;  %v77_v8 = vld [vmem:[#allocation8 + $0x40] sm:$0xff]  ;;  %s1507_s4 = smov 127   ;;  %s1388_s5 = sld [smem:[#allocation4 + $0x8]] }
  0x25   :  { %44 = vst.msk [vmem:[#allocation2] sm:$0xff] %vm43_vm0, %v1506_v4  ;;  %45 = vst.msk [vmem:[#allocation2 + $0x8] sm:$0xff] %vm43_vm0, %v1506_v4  ;;  %v78_v7 = vld [vmem:[#allocation8 + $0x48] sm:$0xff]  ;;  %v75_v10 = vld [vmem:[#allocation8 + $0x30] sm:$0xff]  ;;  %s1385_s6 = sld [smem:[#allocation4 + $0x5]]  ;;  %s1508_s7 = smov 126  }
  0x26   :  { %51 = vst.msk [vmem:[#allocation2 + $0x30] sm:$0xff] %vm43_vm0, %v1506_v4  ;;  %52 = vst.msk [vmem:[#allocation2 + $0x38] sm:$0xff] %vm43_vm0, %v1506_v4  ;;  %v80_v11 = vld [vmem:[#allocation8 + $0x58] sm:$0xff]  ;;  %v79_v12 = vld [vmem:[#allocation8 + $0x50] sm:$0xff]  ;;  %s1389_s8 = sld [smem:[#allocation4 + $0x9]]  ;;  %s1396_s9 = sld [smem:[#allocation4 + $0x10]] }
  0x27   :  { %54 = vst.msk [vmem:[#allocation2 + $0x48] sm:$0xff] %vm43_vm0, %v1506_v4  ;;  %55 = vst.msk [vmem:[#allocation2 + $0x50] sm:$0xff] %vm43_vm0, %v1506_v4  ;;  %107 = vrot.lane.b32.xlu1 %v72_v2, %s1505_s30  ;;  %103 = vrot.lane.b32.xlu0 %v70_v3, %s1505_s30  ;;  %v82_v13 = vld [vmem:[#allocation8 + $0x68] sm:$0xff]  ;;  %v81_v14 = vld [vmem:[#allocation8 + $0x60] sm:$0xff]  ;;  %s1392_s10 = sld [smem:[#allocation4 + $0xc]]  ;;  %s1386_s12 = sld [smem:[#allocation4 + $0x6]] }
  0x28   :  { %57 = vst.msk [vmem:[#allocation2 + $0x60] sm:$0xff] %vm43_vm0, %v1506_v4  ;;  %58 = vst.msk [vmem:[#allocation2 + $0x68] sm:$0xff] %vm43_vm0, %v1506_v4  ;;  %v83_v15 = vld [vmem:[#allocation8 + $0x70] sm:$0xff]  ;;  %v84_v16 = vld [vmem:[#allocation8 + $0x78] sm:$0xff]  ;;  %s1408_s11 = sld [smem:[#allocation4 + $0x1c]]  ;;  %s1404_s13 = sld [smem:[#allocation4 + $0x18]] }
  0x29   :  { %60 = vst.msk [vmem:[#allocation2 + $0x78] sm:$0xff] %vm43_vm0, %v1506_v4  ;;  %61 = vst.msk [vmem:[#allocation2 + $0x80] sm:$0xff] %vm43_vm0, %v1506_v4  ;;  %v300_v21 = vstv %s1384_s2  ;;  %s1400_s14 = sld [smem:[#allocation4 + $0x14]]  ;;  %s166_s15 = sld [smem:[#allocation4]]  ;;  %vm249_vm3 = vcmask 1046528   ;;  %vm281_vm4 = vcmask 1045504  }
  0x2a   :  { %63 = vst.msk [vmem:[#allocation2 + $0x90] sm:$0xff] %vm43_vm0, %v1506_v4  ;;  %64 = vst.msk [vmem:[#allocation2 + $0x98] sm:$0xff] %vm43_vm0, %v1506_v4  ;;  %v403_v38 = vstv %s1388_s5  ;;  %s1745_s16 = sld [smem:[#allocation4 + $0x20]]  ;;  %s1397_s17 = sld [smem:[#allocation4 + $0x11]]  ;;  %vm1358_vm5 = vcmask 130048  }
  0x2b   :  { %66 = vst.msk [vmem:[#allocation2 + $0xa8] sm:$0xff] %vm43_vm0, %v1506_v4  ;;  %67 = vst.msk [vmem:[#allocation2 + $0xb0] sm:$0xff] %vm43_vm0, %v1506_v4  ;;  %111 = vrot.lane.b32.xlu1 %v74_v5, %s1505_s30  ;;  %109 = vrot.lane.b32.xlu0 %v73_v6, %s1505_s30  ;;  %v577_v48 = vstv %s1385_s6  ;;  %s1409_s18 = sld [smem:[#allocation4 + $0x1d]]  ;;  %s1413_s20 = sld [smem:[#allocation4 + $0x21]] }
  0x2c   :  { %50 = vst.msk [vmem:[#allocation2 + $0x28] sm:$0x3] %vm46_vm1, %v1506_v4  ;;  %47 = vst.msk [vmem:[#allocation2 + $0x10] sm:$0x3] %vm46_vm1, %v1506_v4  ;;  %v680_v56 = vstv %s1389_s8  ;;  %v325_v60 = vstv %s1396_s9  ;;  %s1401_s19 = sld [smem:[#allocation4 + $0x15]]  ;;  %s1398_s21 = sld [smem:[#allocation4 + $0x12]] }
  0x2d   :  { %53 = vst.msk [vmem:[#allocation2 + $0x40] sm:$0x3] %vm46_vm1, %v1506_v4  ;;  %56 = vst.msk [vmem:[#allocation2 + $0x58] sm:$0x3] %vm46_vm1, %v1506_v4  ;;  %v1648_v61 = vstv %s1392_s10  ;;  %v1656_v1 = vstv %s1386_s12  ;;  %s1410_s22 = sld [smem:[#allocation4 + $0x1e]]  ;;  %s1826_s0 = sld [smem:[#allocation4 + $0x1a]] }
  0x2e   :  { %59 = vst.msk [vmem:[#allocation2 + $0x70] sm:$0x3] %vm46_vm1, %v1506_v4  ;;  %62 = vst.msk [vmem:[#allocation2 + $0x88] sm:$0x3] %vm46_vm1, %v1506_v4  ;;  %v1654_v0 = vstv %s1408_s11  ;;  %v1664_v6 = vstv %s1404_s13  ;;  %s1824_s23 = sld [smem:[#allocation4 + $0xe]]  ;;  %s1830_s24 = sld [smem:[#allocation4 + $0xf]] }
  0x2f   :  { %65 = vst.msk [vmem:[#allocation2 + $0xa0] sm:$0x3] %vm46_vm1, %v1506_v4  ;;  %68 = vst.msk [vmem:[#allocation2 + $0xb8] sm:$0x3] %vm46_vm1, %v1506_v4  ;;  %119 = vrot.lane.b32.xlu1 %v78_v7, %s1505_s30  ;;  %117 = vrot.lane.b32.xlu0 %v77_v8, %s1505_s30  ;;  %s1832_s25 = sld [smem:[#allocation4 + $0x1b]]  ;;  %s1390_s28 = sld [smem:[#allocation4 + $0xa]] }
  0x30   :  { %s1402_s29 = sld [smem:[#allocation4 + $0x16]]  ;;  %s1387_s2 = sld [smem:[#allocation4 + $0x7]] }
  0x31   :  { %s1399_s5 = sld [smem:[#allocation4 + $0x13]]  ;;  %s1411_s6 = sld [smem:[#allocation4 + $0x1f]] }
  0x32   :  { %s2106_s8 = sld [smem:[#allocation4 + $0xb]]  ;;  %s2117_s9 = sld [smem:[#allocation4 + $0x1]] }
  0x33   :  { %115 = vrot.lane.b32.xlu1 %v76_v9, %s1505_s30  ;;  %113 = vrot.lane.b32.xlu0 %v75_v10, %s1505_s30  ;;  %s2119_s10 = sld [smem:[#allocation4 + $0xd]]  ;;  %s2123_s11 = sld [smem:[#allocation4 + $0x17]] }
  0x34   :  { %s2125_s12 = sld [smem:[#allocation4 + $0x19]]  ;;  %s2134_s13 = sld [smem:[#allocation4 + $0x23]] }
  0x37   :  { %123 = vrot.lane.b32.xlu1 %v80_v11, %s1505_s30  ;;  %121 = vrot.lane.b32.xlu0 %v79_v12, %s1505_s30  ;;  %v1675_v11 = vstv %s1400_s14  ;;  %v1677_v12 = vstv %s166_s15 }
  0x3b   :  { %127 = vrot.lane.b32.xlu1 %v82_v13, %s1505_s30  ;;  %125 = vrot.lane.b32.xlu0 %v81_v14, %s1505_s30 }
  0x3f   :  { %129 = vrot.lane.b32.xlu0 %v83_v15, %s1505_s30  ;;  %131 = vrot.lane.b32.xlu1 %v84_v16, %s1505_s30  ;;  %s1414_s30 = sld [smem:[#allocation4 + $0x22]] }
  0x95   :  { %v106_v17 = vpop.permute.xlu1 %105  ;;  %v102_v18 = vpop.permute.xlu0 %101 }
  0x96   :  { %152 = vst.msk [vmem:[#allocation2 + $0x19] sm:$0xff] %vm149_vm2, %v106_v17  ;;  %150 = vst.msk [vmem:[#allocation2 + $0x1] sm:$0xff] %vm149_vm2, %v102_v18 }
  0x99   :  { %v108_v19 = vpop.permute.xlu1 %107  ;;  %v104_v20 = vpop.permute.xlu0 %103 }
  0x9a   :  { %153 = vst.msk [vmem:[#allocation2 + $0x21] sm:$0xff] %vm149_vm2, %v108_v19  ;;  %151 = vst.msk [vmem:[#allocation2 + $0x9] sm:$0xff] %vm149_vm2, %v104_v20 }
  0x9d   :  { %v112_v22 = vpop.permute.xlu1 %111  ;;  %v110_v23 = vpop.permute.xlu0 %109  ;;  %v1592_v24 = vld [vmem:[#allocation2] sm:$0xff]  ;;  %v1628_v49 = vld [vmem:[#allocation2 + $0x18] sm:$0xff] }
  0x9e   :  { %155 = vst.msk [vmem:[#allocation2 + $0x39] sm:$0xff] %vm149_vm2, %v112_v22  ;;  %154 = vst.msk [vmem:[#allocation2 + $0x31] sm:$0xff] %vm149_vm2, %v110_v23  ;;  %v301_v25 = vmul.f32 %v300_v21, %v1592_v24  ;;  %v404_v42 = vmul.f32 %v403_v38, %v1592_v24  ;;  %v578_v53 = vmul.f32 %v577_v48, %v1628_v49 }
  0x9f   :  { %v681_v59 = vmul.f32 %v680_v56, %v1628_v49  ;;  %v237_v7 = vmul.f32 %v1648_v61, %v1592_v24  ;;  %v326_v8 = vmul.f32 %v325_v60, %v1592_v24  ;;  %v1673_v10 = vmul.f32 %v1654_v0, %v1592_v24 }
  0xa0   :  { %309 = vrot.lane.b32.xlu0 %v301_v25, %s1507_s4  ;;  %v269_v20 = vmul.f32 %v1664_v6, %v1592_v24 }
  0xa1   :  { %v120_v26 = vpop.permute.xlu1 %119  ;;  %v118_v27 = vpop.permute.xlu0 %117  ;;  %v1598_v28 = vld [vmem:[#allocation2 + $0x8] sm:$0xff]  ;;  %v1626_v47 = vld [vmem:[#allocation2 + $0x20] sm:$0xff]  ;;  %v1644_v57 = vld [vmem:[#allocation2 + $0x10] sm:$0x3]  ;;  %v250_v25 = vrot.slane %v237_v7, 1 }
  0xa2   :  { %159 = vst.msk [vmem:[#allocation2 + $0x69] sm:$0xff] %vm149_vm2, %v120_v26  ;;  %158 = vst.msk [vmem:[#allocation2 + $0x61] sm:$0xff] %vm149_vm2, %v118_v27  ;;  %v302_v29 = vmul.f32 %v300_v21, %v1598_v28  ;;  %v405_v41 = vmul.f32 %v403_v38, %v1598_v28  ;;  %v579_v52 = vmul.f32 %v577_v48, %v1626_v47 }
  0xa3   :  { %v682_v58 = vmul.f32 %v680_v56, %v1626_v47  ;;  %v327_v62 = vmul.f32 %v325_v60, %v1598_v28  ;;  %v328_v63 = vmul.f32 %v325_v60, %v1644_v57  ;;  %v238_v15 = vmul.f32 %v1648_v61, %v1598_v28 }
  0xa4   :  { %311 = vrot.lane.b32.xlu1 %v302_v29, %s1507_s4  ;;  %v270_v16 = vmul.f32 %v1664_v6, %v1598_v28  ;;  %v366_v27 = vmul.f32 %v1654_v0, %v1598_v28  ;;  %v228_v29 = vmul.f32 %v1677_v12, %v1592_v24  ;;  %v431_v7 = vmul.f32 %v1675_v11, %v1644_v57 }
  0xa5   :  { %v116_v30 = vpop.permute.xlu1 %115  ;;  %v114_v31 = vpop.permute.xlu0 %113  ;;  %v1660_v4 = vld [vmem:[#allocation2 + $0x38] sm:$0xff]  ;;  %v1662_v5 = vld [vmem:[#allocation2 + $0x30] sm:$0xff]  ;;  %v339_v13 = vrot.slane %v327_v62, 1  ;;  %v341_v14 = vrot.slane %v328_v63, 1  ;;  %v251_v22 = vrot.slane %v238_v15, 1  ;;  %v377_v63 = vrot.slane %v1673_v10, 2 }
  0xa6   :  { %157 = vst.msk [vmem:[#allocation2 + $0x51] sm:$0xff] %vm149_vm2, %v116_v30  ;;  %156 = vst.msk [vmem:[#allocation2 + $0x49] sm:$0xff] %vm149_vm2, %v114_v31  ;;  %v856_v17 = vmul.f32 %v1656_v1, %v1660_v4  ;;  %v855_v18 = vmul.f32 %v1656_v1, %v1662_v5  ;;  %v283_v23 = vrot.slane %v270_v16, 2  ;;  %v282_v30 = vrot.slane %v269_v20, 2 }
  0xa7   :  { %v338_v31 = vrot.slane %v326_v8, 1 }
  0xa9   :  { %v1606_v32 = vld [vmem:[#allocation2 + $0x68] sm:$0xff]  ;;  %v1608_v33 = vld [vmem:[#allocation2 + $0x60] sm:$0xff]  ;;  %v124_v34 = vpop.permute.xlu1 %123  ;;  %v122_v35 = vpop.permute.xlu0 %121  ;;  %v1669_v9 = vld [vmem:[#allocation2 + $0x70] sm:$0x3] }
  0xaa   :  { %v304_v36 = vmul.f32 %v300_v21, %v1606_v32  ;;  %v303_v37 = vmul.f32 %v300_v21, %v1608_v33  ;;  %161 = vst.msk [vmem:[#allocation2 + $0x81] sm:$0xff] %vm149_vm2, %v124_v34  ;;  %160 = vst.msk [vmem:[#allocation2 + $0x79] sm:$0xff] %vm149_vm2, %v122_v35  ;;  %v407_v45 = vmul.f32 %v403_v38, %v1606_v32 }
  0xab   :  { %v406_v46 = vmul.f32 %v403_v38, %v1608_v33  ;;  %v330_v19 = vmul.f32 %v325_v60, %v1606_v32  ;;  %v331_v21 = vmul.f32 %v325_v60, %v1669_v9  ;;  %v329_v26 = vmul.f32 %v325_v60, %v1608_v33 }
  0xac   :  { %315 = vrot.lane.b32.xlu1 %v304_v36, %s1507_s4  ;;  %313 = vrot.lane.b32.xlu0 %v303_v37, %s1507_s4  ;;  %v367_v34 = vmul.f32 %v1654_v0, %v1644_v57  ;;  %v252_v35 = vsel %vm249_vm3, %v250_v25, %v251_v22  ;;  %v239_v36 = vmul.f32 %v1648_v61, %v1644_v57 }
  0xad   :  { %v128_v39 = vpop.permute.xlu1 %127  ;;  %v126_v40 = vpop.permute.xlu0 %125  ;;  %v342_v37 = vsel %vm249_vm3, %v339_v13, %v341_v14  ;;  %v264_v38 = vadd.f32 %v252_v35, %v228_v29  ;;  %v241_v15 = vmul.f32 %v1648_v61, %v1606_v32  ;;  %v231_v29 = vmul.f32 %v1677_v12, %v1606_v32 }
  0xae   :  { %163 = vst.msk [vmem:[#allocation2 + $0x99] sm:$0xff] %vm149_vm2, %v128_v39  ;;  %162 = vst.msk [vmem:[#allocation2 + $0x91] sm:$0xff] %vm149_vm2, %v126_v40  ;;  %v284_v39 = vsel %vm281_vm4, %v282_v30, %v283_v23  ;;  %v271_v40 = vmul.f32 %v1664_v6, %v1644_v57  ;;  %v433_v35 = vmul.f32 %v1675_v11, %v1606_v32 }
  0xaf   :  { %v256_v20 = vrot.slane %v241_v15, 1  ;;  %v1790_v15 = vld [vmem:[#allocation2 + $0x28] sm:$0x3] }
  0xb0   :  { %414 = vrot.lane.b32.xlu1 %v405_v41, %s1508_s7  ;;  %412 = vrot.lane.b32.xlu0 %v404_v42, %s1508_s7  ;;  %v340_v41 = vsel %vm249_vm3, %v338_v31, %v339_v13  ;;  %v344_v42 = vrot.slane %v330_v19, 1  ;;  %v272_v31 = vmul.f32 %v1664_v6, %v1608_v33 }
  0xb1   :  { %v130_v43 = vpop.permute.xlu0 %129  ;;  %v132_v44 = vpop.permute.xlu1 %131  ;;  %v1632_v50 = vld [vmem:[#allocation2 + $0x80] sm:$0xff]  ;;  %v1634_v51 = vld [vmem:[#allocation2 + $0x78] sm:$0xff] }
  0xb2   :  { %164 = vst.msk [vmem:[#allocation2 + $0xa9] sm:$0xff] %vm149_vm2, %v130_v43  ;;  %165 = vst.msk [vmem:[#allocation2 + $0xb1] sm:$0xff] %vm149_vm2, %v132_v44  ;;  %v581_v54 = vmul.f32 %v577_v48, %v1632_v50  ;;  %v580_v55 = vmul.f32 %v577_v48, %v1634_v51  ;;  %v684_v2 = vmul.f32 %v680_v56, %v1632_v50  ;;  %v346_v43 = vrot.slane %v331_v21, 1 }
  0xb3   :  { %v683_v3 = vmul.f32 %v680_v56, %v1634_v51  ;;  %v253_v44 = vrot.slane %v239_v36, 1  ;;  %v285_v48 = vrot.slane %v271_v40, 2  ;;  %v274_v21 = vmul.f32 %v1664_v6, %v1669_v9 }
  0xb4   :  { %418 = vrot.lane.b32.xlu1 %v407_v45, %s1508_s7  ;;  %416 = vrot.lane.b32.xlu0 %v406_v46, %s1508_s7  ;;  %v343_v45 = vrot.slane %v329_v26, 1  ;;  %v1710_v46 = vadd.f32 %v284_v39, %v264_v38  ;;  %v347_v8 = vsel %vm249_vm3, %v344_v42, %v346_v43  ;;  %v240_v26 = vmul.f32 %v1648_v61, %v1608_v33 }
  0xb5   :  { %v254_v56 = vsel %vm249_vm3, %v251_v22, %v253_v44  ;;  %v286_v62 = vsel %vm281_vm4, %v283_v23, %v285_v48  ;;  %v290_v30 = vrot.slane %v274_v21, 2  ;;  %v230_v39 = vmul.f32 %v1677_v12, %v1608_v33 }
  0xb6   :  { %v345_v13 = vsel %vm249_vm3, %v343_v45, %v344_v42  ;;  %v287_v40 = vrot.slane %v272_v31, 2  ;;  %v432_v42 = vmul.f32 %v1675_v11, %v1608_v33  ;;  %v641_v31 = vstv %s1409_s18 }
  0xb8   :  { %588 = vrot.lane.b32.xlu1 %v579_v52, %s1507_s4  ;;  %586 = vrot.lane.b32.xlu0 %v578_v53, %s1507_s4  ;;  %v229_v52 = vmul.f32 %v1677_v12, %v1598_v28  ;;  %v378_v53 = vrot.slane %v366_v27, 2 }
  0xba   :  { %v265_v60 = vadd.f32 %v254_v56, %v229_v52 }
  0xbc   :  { %592 = vrot.lane.b32.xlu1 %v581_v54, %s1507_s4  ;;  %590 = vrot.lane.b32.xlu0 %v580_v55, %s1507_s4  ;;  %v380_v54 = vrot.slane %v367_v34, 2  ;;  %v430_v55 = vmul.f32 %v1675_v11, %v1598_v28  ;;  %v1733_v14 = vadd.f32 %v286_v62, %v265_v60  ;;  %v444_v34 = vrot.slane %v431_v7, 1 }
  0xbd   :  { %v447_v60 = vrot.slane %v433_v35, 1 }
  0xbe   :  { %v381_v10 = vsel %vm281_vm4, %v378_v53, %v380_v54  ;;  %v442_v16 = vrot.slane %v430_v55, 1 }
  0xc0   :  { %691 = vrot.lane.b32.xlu1 %v682_v58, %s1508_s7  ;;  %689 = vrot.lane.b32.xlu0 %v681_v59, %s1508_s7  ;;  %v369_v58 = vmul.f32 %v1654_v0, %v1606_v32  ;;  %v429_v59 = vmul.f32 %v1675_v11, %v1592_v24 }
  0xc2   :  { %v383_v19 = vrot.slane %v369_v58, 2  ;;  %v441_v12 = vrot.slane %v429_v59, 1 }
  0xc4   :  { %695 = vrot.lane.b32.xlu1 %v684_v2, %s1508_s7  ;;  %693 = vrot.lane.b32.xlu0 %v683_v3, %s1508_s7  ;;  %v370_v2 = vmul.f32 %v1654_v0, %v1669_v9  ;;  %v368_v3 = vmul.f32 %v1654_v0, %v1608_v33  ;;  %v242_v0 = vmul.f32 %v1648_v61, %v1669_v9 }
  0xc5   :  { %v443_v58 = vsel %vm249_vm3, %v441_v12, %v442_v16 }
  0xc6   :  { %v385_v22 = vrot.slane %v370_v2, 2  ;;  %v258_v23 = vrot.slane %v242_v0, 1  ;;  %v382_v27 = vrot.slane %v368_v3, 2 }
  0xc8   :  { %865 = vrot.lane.b32.xlu1 %v856_v17, %s1507_s4  ;;  %863 = vrot.lane.b32.xlu0 %v855_v18, %s1507_s4  ;;  %v273_v17 = vmul.f32 %v1664_v6, %v1606_v32  ;;  %v379_v18 = vsel %vm281_vm4, %v377_v63, %v378_v53  ;;  %v259_v36 = vsel %vm249_vm3, %v256_v20, %v258_v23  ;;  %v467_v53 = vstv %s1745_s16 }
  0xc9   :  { %v267_v61 = vadd.f32 %v259_v36, %v231_v29  ;;  %v386_v6 = vsel %vm281_vm4, %v383_v19, %v385_v22  ;;  %v384_v44 = vsel %vm281_vm4, %v382_v27, %v383_v19  ;;  %v469_v55 = vmul.f32 %v467_v53, %v1598_v28 }
  0xca   :  { %v288_v25 = vrot.slane %v273_v17, 2  ;;  %v470_v56 = vmul.f32 %v467_v53, %v1644_v57  ;;  %v446_v63 = vrot.slane %v432_v42, 1  ;;  %v468_v59 = vmul.f32 %v467_v53, %v1592_v24 }
  0xcb   :  { %v481_v2 = vrot.slane %v469_v55, 2  ;;  %v472_v7 = vmul.f32 %v467_v53, %v1606_v32  ;;  %v473_v57 = vmul.f32 %v467_v53, %v1669_v9  ;;  %v602_v24 = vstv %s1397_s17 }
  0xcc   :  { %350 = vrot.lane.b32.xlu1 %v342_v37, %s1507_s4  ;;  %348 = vrot.lane.b32.xlu0 %v340_v41, %s1507_s4  ;;  %v255_v37 = vrot.slane %v240_v26, 1  ;;  %v291_v38 = vsel %vm281_vm4, %v288_v25, %v290_v30  ;;  %v434_v41 = vmul.f32 %v1675_v11, %v1669_v9  ;;  %v289_v52 = vsel %vm281_vm4, %v287_v40, %v288_v25 }
  0xcd   :  { %v1770_v45 = vadd.f32 %v291_v38, %v267_v61  ;;  %v445_v11 = vsel %vm249_vm3, %v442_v16, %v444_v34  ;;  %v483_v3 = vrot.slane %v470_v56, 2  ;;  %v448_v28 = vsel %vm249_vm3, %v446_v63, %v447_v60 }
  0xce   :  { %v257_v43 = vsel %vm249_vm3, %v255_v37, %v256_v20  ;;  %v449_v62 = vrot.slane %v434_v41, 1  ;;  %v604_v32 = vmul.f32 %v602_v24, %v1626_v47  ;;  %v605_v0 = vmul.f32 %v602_v24, %v1790_v15  ;;  %v1801_v20 = vld [vmem:[#allocation2 + $0x88] sm:$0x3] }
  0xcf   :  { %v266_v48 = vadd.f32 %v257_v43, %v230_v39  ;;  %v484_v16 = vsel %vm281_vm4, %v481_v2, %v483_v3  ;;  %v486_v9 = vrot.slane %v472_v7, 2  ;;  %v603_v19 = vmul.f32 %v602_v24, %v1628_v49 }
  0xd0   :  { %354 = vrot.lane.b32.xlu1 %v347_v8, %s1507_s4  ;;  %352 = vrot.lane.b32.xlu0 %v345_v13, %s1507_s4  ;;  %v450_v8 = vsel %vm249_vm3, %v447_v60, %v449_v62  ;;  %v471_v13 = vmul.f32 %v467_v53, %v1608_v33  ;;  %v616_v21 = vrot.slane %v604_v32, 1  ;;  %v618_v22 = vrot.slane %v605_v0, 1 }
  0xd1   :  { %v1776_v54 = vadd.f32 %v289_v52, %v266_v48  ;;  %v607_v23 = vmul.f32 %v602_v24, %v1632_v50  ;;  %v608_v27 = vmul.f32 %v602_v24, %v1801_v20  ;;  %v606_v29 = vmul.f32 %v602_v24, %v1634_v51 }
  0xd2   :  { %v485_v33 = vrot.slane %v471_v13, 2  ;;  %v615_v30 = vrot.slane %v603_v19, 1  ;;  %v619_v34 = vsel %vm249_vm3, %v616_v21, %v618_v22  ;;  %v643_v36 = vmul.f32 %v641_v31, %v1626_v47 }
  0xd3   :  { %v621_v37 = vrot.slane %v607_v23, 1  ;;  %v623_v61 = vrot.slane %v608_v27, 1  ;;  %v620_v38 = vrot.slane %v606_v29, 1  ;;  %v644_v39 = vmul.f32 %v641_v31, %v1790_v15 }
  0xd4   :  { %389 = vrot.lane.b32.xlu1 %v381_v10, %s1507_s4  ;;  %387 = vrot.lane.b32.xlu0 %v379_v18, %s1507_s4  ;;  %v480_v10 = vrot.slane %v468_v59, 2  ;;  %v488_v18 = vrot.slane %v473_v57, 2  ;;  %v487_v26 = vsel %vm281_vm4, %v485_v33, %v486_v9  ;;  %v617_v35 = vsel %vm249_vm3, %v615_v30, %v616_v21  ;;  %v1854_v21 = vld [vmem:[#allocation2 + $0x98] sm:$0xff] }
  0xd5   :  { %v642_v40 = vmul.f32 %v641_v31, %v1628_v49  ;;  %v646_v41 = vmul.f32 %v641_v31, %v1632_v50  ;;  %v647_v42 = vmul.f32 %v641_v31, %v1801_v20  ;;  %v624_v43 = vsel %vm249_vm3, %v621_v37, %v623_v61 }
  0xd6   :  { %v482_v17 = vsel %vm281_vm4, %v480_v10, %v481_v2  ;;  %v489_v25 = vsel %vm281_vm4, %v486_v9, %v488_v18  ;;  %v657_v48 = vrot.slane %v644_v39, 2  ;;  %v645_v52 = vmul.f32 %v641_v31, %v1634_v51 }
  0xd7   :  { %v654_v12 = vrot.slane %v642_v40, 2  ;;  %v705_v53 = vstv %s1401_s19  ;;  %v660_v55 = vrot.slane %v646_v41, 2  ;;  %v662_v62 = vrot.slane %v647_v42, 2 }
  0xd8   :  { %393 = vrot.lane.b32.xlu1 %v386_v6, %s1507_s4  ;;  %391 = vrot.lane.b32.xlu0 %v384_v44, %s1507_s4  ;;  %v655_v6 = vrot.slane %v643_v36, 2  ;;  %v622_v44 = vsel %vm249_vm3, %v620_v38, %v621_v37  ;;  %v707_v56 = vmul.f32 %v705_v53, %v1626_v47  ;;  %v659_v63 = vrot.slane %v645_v52, 2 }
  0xd9   :  { %v708_v59 = vmul.f32 %v705_v53, %v1790_v15  ;;  %v710_v2 = vmul.f32 %v705_v53, %v1632_v50  ;;  %v711_v3 = vmul.f32 %v705_v53, %v1801_v20  ;;  %v706_v7 = vmul.f32 %v705_v53, %v1628_v49 }
  0xda   :  { %v658_v60 = vsel %vm281_vm4, %v655_v6, %v657_v48  ;;  %v1843_v13 = vstv %s1398_s21  ;;  %v1845_v10 = vstv %s1410_s22  ;;  %v663_v24 = vsel %vm281_vm4, %v660_v55, %v662_v62 }
  0xdb   :  { %v721_v32 = vrot.slane %v708_v59, 1  ;;  %v718_v33 = vrot.slane %v706_v7, 1  ;;  %v1857_v22 = vstv %s1824_s23  ;;  %v1860_v23 = vstv %s1826_s0  ;;  %v1904_v59 = vld [vmem:[#allocation2 + $0x50] sm:$0xff] }
  0xdc   :  { %453 = vrot.lane.b32.xlu1 %v445_v11, %s1508_s7  ;;  %451 = vrot.lane.b32.xlu0 %v443_v58, %s1508_s7  ;;  %v656_v11 = vsel %vm281_vm4, %v654_v12, %v655_v6  ;;  %v744_v58 = vstv %s1413_s20  ;;  %v1866_v27 = vstv %s1830_s24  ;;  %v797_v38 = vmul.f32 %v1857_v22, %v1854_v21 }
  0xdd   :  { %v745_v57 = vmul.f32 %v744_v58, %v1628_v49  ;;  %v746_v0 = vmul.f32 %v744_v58, %v1626_v47  ;;  %v724_v49 = vrot.slane %v710_v2, 1  ;;  %v747_v9 = vmul.f32 %v744_v58, %v1790_v15  ;;  %v1906_v2 = vld [vmem:[#allocation2 + $0x58] sm:$0x3] }
  0xde   :  { %v749_v18 = vmul.f32 %v744_v58, %v1632_v50  ;;  %v1869_v29 = vstv %s1832_s25  ;;  %v811_v42 = vrot.slane %v797_v38, 1  ;;  %v1957_v38 = vld [vmem:[#allocation2 + $0xa8] sm:$0xff] }
  0xdf   :  { %v757_v47 = vrot.slane %v745_v57, 2  ;;  %v758_v31 = vrot.slane %v746_v0, 2  ;;  %v760_v37 = vrot.slane %v747_v9, 2  ;;  %v1917_v57 = vld [vmem:[#allocation2 + $0x48] sm:$0xff] }
  0xe0   :  { %457 = vrot.lane.b32.xlu1 %v450_v8, %s1508_s7  ;;  %455 = vrot.lane.b32.xlu0 %v448_v28, %s1508_s7  ;;  %v709_v8 = vmul.f32 %v705_v53, %v1634_v51  ;;  %v719_v28 = vrot.slane %v707_v56, 1  ;;  %v763_v61 = vrot.slane %v749_v18, 2  ;;  %v1900_v56 = vmul.f32 %v1843_v13, %v1660_v4 }
  0xe1   :  { %v761_v62 = vsel %vm281_vm4, %v758_v31, %v760_v37  ;;  %v1101_v37 = vmul.f32 %v1869_v29, %v1917_v57 }
  0xe2   :  { %v723_v19 = vrot.slane %v709_v8, 1  ;;  %v722_v30 = vsel %vm249_vm3, %v719_v28, %v721_v32  ;;  %v720_v50 = vsel %vm249_vm3, %v718_v33, %v719_v28  ;;  %v893_v9 = vrot.slane %v1900_v56, 1  ;;  %v1939_v33 = vld [vmem:[#allocation2 + $0xb8] sm:$0x3] }
  0xe4   :  { %492 = vrot.lane.b32.xlu1 %v484_v16, %s1508_s7  ;;  %490 = vrot.lane.b32.xlu0 %v482_v17, %s1508_s7  ;;  %v661_v16 = vsel %vm281_vm4, %v659_v63, %v660_v55  ;;  %v726_v17 = vrot.slane %v711_v3, 1  ;;  %v725_v39 = vsel %vm249_vm3, %v723_v19, %v724_v49  ;;  %v1896_v55 = vld [vmem:[#allocation2 + $0x40] sm:$0x3]  ;;  %v759_v63 = vsel %vm281_vm4, %v757_v47, %v758_v31 }
  0xe5   :  { %v882_v0 = vmul.f32 %v1843_v13, %v1896_v55  ;;  %v1071_v19 = vmul.f32 %v1866_v27, %v1904_v59  ;;  %v1072_v47 = vmul.f32 %v1866_v27, %v1906_v2  ;;  %v1070_v31 = vmul.f32 %v1866_v27, %v1917_v57 }
  0xe6   :  { %v727_v36 = vsel %vm249_vm3, %v724_v49, %v726_v17  ;;  %v880_v49 = vmul.f32 %v1843_v13, %v1662_v5  ;;  %v884_v17 = vmul.f32 %v1843_v13, %v1854_v21 }
  0xe8   :  { %496 = vrot.lane.b32.xlu1 %v489_v25, %s1508_s7  ;;  %494 = vrot.lane.b32.xlu0 %v487_v26, %s1508_s7  ;;  %v750_v25 = vmul.f32 %v744_v58, %v1801_v20  ;;  %v1863_v26 = vld [vmem:[#allocation2 + $0xa0] sm:$0x3] }
  0xe9   :  { %v798_v40 = vmul.f32 %v1857_v22, %v1863_v26  ;;  %v829_v6 = vmul.f32 %v1860_v23, %v1863_v26  ;;  %v885_v18 = vmul.f32 %v1843_v13, %v1863_v26 }
  0xea   :  { %v765_v41 = vrot.slane %v750_v25, 2 }
  0xeb   :  { %v813_v52 = vrot.slane %v798_v40, 1  ;;  %v844_v53 = vrot.slane %v829_v6, 2  ;;  %v1082_v40 = vrot.slane %v1070_v31, 1 }
  0xec   :  { %627 = vrot.lane.b32.xlu1 %v619_v34, %s1507_s4  ;;  %625 = vrot.lane.b32.xlu0 %v617_v35, %s1507_s4  ;;  %v748_v34 = vmul.f32 %v744_v58, %v1634_v51  ;;  %v1874_v35 = vld [vmem:[#allocation2 + $0x90] sm:$0xff]  ;;  %v828_v51 = vmul.f32 %v1860_v23, %v1854_v21  ;;  %v766_v8 = vsel %vm281_vm4, %v763_v61, %v765_v41  ;;  %v1113_v41 = vrot.slane %v1101_v37, 2 }
  0xed   :  { %v1909_v3 = vsel %vm249_vm3, %v811_v42, %v813_v52  ;;  %v857_v28 = vmul.f32 %v1656_v1, %v1874_v35  ;;  %v883_v25 = vmul.f32 %v1843_v13, %v1874_v35 }
  0xee   :  { %v762_v48 = vrot.slane %v748_v34, 2  ;;  %v842_v12 = vrot.slane %v828_v51, 2  ;;  %2307 = vst [vmem:[#allocation13_spill] sm:$0xff] %v1909_v3  ;;  %v1083_v34 = vrot.slane %v1071_v19, 1  ;;  %v1075_v51 = vmul.f32 %v1866_v27, %v1939_v33 }
  0xef   :  { %v897_v31 = vrot.slane %v883_v25, 1 }
  0xf0   :  { %631 = vrot.lane.b32.xlu1 %v624_v43, %s1507_s4  ;;  %629 = vrot.lane.b32.xlu0 %v622_v44, %s1507_s4  ;;  %v796_v43 = vmul.f32 %v1857_v22, %v1874_v35  ;;  %v827_v44 = vmul.f32 %v1860_v23, %v1874_v35  ;;  %v1912_v7 = vsel %vm281_vm4, %v842_v12, %v844_v53  ;;  %v1090_v52 = vrot.slane %v1075_v51, 1 }
  0xf1   :  { %2308 = vst [vmem:[#allocation14_spill] sm:$0xff] %v1912_v7  ;;  %v764_v32 = vsel %vm281_vm4, %v762_v48, %v763_v61  ;;  %v1972_v48 = vsel %vm249_vm3, %v1082_v40, %v1083_v34  ;;  %v924_v40 = vmul.f32 %v1845_v10, %v1863_v26  ;;  %v922_v51 = vmul.f32 %v1845_v10, %v1874_v35 }
  0xf2   :  { %v810_v58 = vrot.slane %v796_v43, 1  ;;  %2313 = vst [vmem:[#allocation19_spill] sm:$0xff] %v1972_v48 }
  0xf4   :  { %666 = vrot.lane.b32.xlu1 %v658_v60, %s1507_s4  ;;  %664 = vrot.lane.b32.xlu0 %v656_v11, %s1507_s4  ;;  %v858_v11 = vmul.f32 %v1656_v1, %v1854_v21  ;;  %v841_v60 = vrot.slane %v827_v44, 2  ;;  %v1932_v1 = vld [vmem:[#allocation2 + $0xb0] sm:$0xff] }
  0xf5   :  { %v1074_v61 = vmul.f32 %v1866_v27, %v1932_v1  ;;  %v1105_v43 = vmul.f32 %v1869_v29, %v1932_v1 }
  0xf7   :  { %v1119_v56 = vrot.slane %v1105_v43, 2 }
  0xf8   :  { %670 = vrot.lane.b32.xlu1 %v663_v24, %s1507_s4  ;;  %668 = vrot.lane.b32.xlu0 %v661_v16, %s1507_s4  ;;  %v1920_v24 = vsel %vm249_vm3, %v810_v58, %v811_v42  ;;  %v1923_v16 = vsel %vm281_vm4, %v841_v60, %v842_v12  ;;  %v1088_v42 = vrot.slane %v1074_v61, 1  ;;  %v1106_v12 = vmul.f32 %v1869_v29, %v1939_v33 }
  0xf9   :  { %2309 = vst [vmem:[#allocation15_spill] sm:$0xff] %v1920_v24  ;;  %2310 = vst [vmem:[#allocation16_spill] sm:$0xff] %v1923_v16  ;;  %v1073_v58 = vmul.f32 %v1866_v27, %v1957_v38  ;;  %v1104_v60 = vmul.f32 %v1869_v29, %v1957_v38 }
  0xfb   :  { %v1087_v19 = vrot.slane %v1073_v58, 1 }
  0xfc   :  { %730 = vrot.lane.b32.xlu1 %v722_v30, %s1508_s7  ;;  %728 = vrot.lane.b32.xlu0 %v720_v50, %s1508_s7  ;;  %v1102_v30 = vmul.f32 %v1869_v29, %v1904_v59  ;;  %v1103_v50 = vmul.f32 %v1869_v29, %v1906_v2  ;;  %v920_v29 = vmul.f32 %v1845_v10, %v1660_v4 }
  0xfe   :  { %v1114_v13 = vrot.slane %v1102_v30, 2  ;;  %v898_v30 = vrot.slane %v884_v17, 1  ;;  %v932_v37 = vrot.slane %v920_v29, 2 }
 0x100   :  { %734 = vrot.lane.b32.xlu1 %v727_v36, %s1508_s7  ;;  %732 = vrot.lane.b32.xlu0 %v725_v39, %s1508_s7  ;;  %v1085_v36 = vrot.slane %v1072_v47, 1  ;;  %v1116_v39 = vrot.slane %v1103_v50, 2  ;;  %v1977_v53 = vsel %vm281_vm4, %v1113_v41, %v1114_v13  ;;  %v1118_v47 = vrot.slane %v1104_v60, 2 }
 0x101   :  { %2314 = vst [vmem:[#allocation20_spill] sm:$0xff] %v1977_v53  ;;  %v900_v50 = vrot.slane %v885_v18, 1  ;;  %v919_v18 = vmul.f32 %v1845_v10, %v1662_v5  ;;  %v957_v60 = vstv %s1390_s28 }
 0x102   :  { %v1964_v6 = vsel %vm249_vm3, %v1083_v34, %v1085_v36  ;;  %v1969_v44 = vsel %vm281_vm4, %v1114_v13, %v1116_v39  ;;  %v899_v36 = vsel %vm249_vm3, %v897_v31, %v898_v30  ;;  %v923_v13 = vmul.f32 %v1845_v10, %v1854_v21 }
 0x103   :  { %2311 = vst [vmem:[#allocation17_spill] sm:$0xff] %v1964_v6  ;;  %2312 = vst [vmem:[#allocation18_spill] sm:$0xff] %v1969_v44  ;;  %v901_v25 = vsel %vm249_vm3, %v898_v30, %v900_v50 }
 0x104   :  { %769 = vrot.lane.b32.xlu1 %v761_v62, %s1508_s7  ;;  %767 = vrot.lane.b32.xlu0 %v759_v63, %s1508_s7  ;;  %v895_v62 = vrot.slane %v882_v0, 1  ;;  %v892_v63 = vrot.slane %v880_v49, 1  ;;  %v921_v0 = vmul.f32 %v1845_v10, %v1896_v55  ;;  %v1996_v49 = vsel %vm249_vm3, %v1087_v19, %v1088_v42 }
 0x105   :  { %2317 = vst [vmem:[#allocation23_spill] sm:$0xff] %v1996_v49  ;;  %v937_v43 = vrot.slane %v923_v13, 2  ;;  %v958_v19 = vmul.f32 %v957_v60, %v1662_v5 }
 0x106   :  { %v894_v17 = vsel %vm249_vm3, %v892_v63, %v893_v9  ;;  %v934_v61 = vrot.slane %v921_v0, 2  ;;  %v1021_v0 = vstv %s1414_s30 }
 0x108   :  { %773 = vrot.lane.b32.xlu1 %v766_v8, %s1508_s7  ;;  %771 = vrot.lane.b32.xlu0 %v764_v32, %s1508_s7  ;;  %v1984_v8 = vsel %vm249_vm3, %v1088_v42, %v1090_v52  ;;  %v1121_v32 = vrot.slane %v1106_v12, 2  ;;  %v935_v42 = vsel %vm281_vm4, %v932_v37, %v934_v61  ;;  %v939_v12 = vrot.slane %v924_v40, 2 }
 0x109   :  { %2315 = vst [vmem:[#allocation21_spill] sm:$0xff] %v1984_v8 }
 0x10a   :  { %v1989_v27 = vsel %vm281_vm4, %v1119_v56, %v1121_v32  ;;  %v940_v10 = vsel %vm281_vm4, %v937_v43, %v939_v12  ;;  %v959_v32 = vmul.f32 %v957_v60, %v1660_v4 }
 0x10b   :  { %2316 = vst [vmem:[#allocation22_spill] sm:$0xff] %v1989_v27  ;;  %v1433_v27 = vld [vmem:[#allocation2 + $0x20] sm:$0xff] }
 0x10c   :  { %869 = vrot.lane.b32.xlu1 %v858_v11, %s1507_s4  ;;  %867 = vrot.lane.b32.xlu0 %v857_v28, %s1507_s4  ;;  %v1999_v11 = vsel %vm281_vm4, %v1118_v47, %v1119_v56  ;;  %v896_v28 = vsel %vm249_vm3, %v893_v9, %v895_v62  ;;  %v931_v9 = vrot.slane %v919_v18, 2  ;;  %v936_v56 = vrot.slane %v922_v51, 2 }
 0x10d   :  { %2318 = vst [vmem:[#allocation24_spill] sm:$0xff] %v1999_v11  ;;  %v982_v62 = vstv %s1402_s29  ;;  %v961_v18 = vmul.f32 %v957_v60, %v1854_v21  ;;  %v2153_v11 = vstv %s2125_s12 }
 0x10e   :  { %v933_v52 = vsel %vm281_vm4, %v931_v9, %v932_v37  ;;  %v938_v58 = vsel %vm281_vm4, %v936_v56, %v937_v43  ;;  %v984_v47 = vmul.f32 %v982_v62, %v1660_v4  ;;  %v985_v31 = vmul.f32 %v982_v62, %v1896_v55 }
 0x10f   :  { %v983_v29 = vmul.f32 %v982_v62, %v1662_v5  ;;  %v986_v61 = vmul.f32 %v982_v62, %v1874_v35  ;;  %v1022_v56 = vmul.f32 %v1021_v0, %v1662_v5  ;;  %v1025_v5 = vmul.f32 %v1021_v0, %v1874_v35 }
 0x110   :  { %904 = vrot.lane.b32.xlu1 %v896_v28, %s1507_s4  ;;  %902 = vrot.lane.b32.xlu0 %v894_v17, %s1507_s4  ;;  %v548_v3 = vmul.f32 %v1433_v27, %v2153_v11 }
 0x111   :  { %v995_v37 = vrot.slane %v983_v29, 1  ;;  %v1000_v12 = vrot.slane %v986_v61, 1  ;;  %v1156_v61 = vstv %s1399_s5 }
 0x112   :  { %v310_v34 = vpop.permute.xlu0 %309 }
 0x113   :  { %v2012_v39 = vadd.f32 %v310_v34, %v1710_v46  ;;  %v996_v34 = vrot.slane %v984_v47, 1 }
 0x114   :  { %908 = vrot.lane.b32.xlu1 %v901_v25, %s1507_s4  ;;  %906 = vrot.lane.b32.xlu0 %v899_v36, %s1507_s4  ;;  %v988_v25 = vmul.f32 %v982_v62, %v1863_v26  ;;  %v998_v36 = vrot.slane %v985_v31, 1 }
 0x116   :  { %v312_v41 = vpop.permute.xlu1 %311  ;;  %v1003_v51 = vrot.slane %v988_v25, 1  ;;  %v999_v43 = vsel %vm249_vm3, %v996_v34, %v998_v36  ;;  %v1039_v25 = vrot.slane %v1025_v5, 2  ;;  %v1162_v5 = vmul.f32 %v1156_v61, %v1939_v33 }
 0x117   :  { %v2022_v46 = vadd.f32 %v312_v41, %v1733_v14  ;;  %v1023_v41 = vmul.f32 %v1021_v0, %v1660_v4 }
 0x118   :  { %943 = vrot.lane.b32.xlu1 %v935_v42, %s1507_s4  ;;  %941 = vrot.lane.b32.xlu0 %v933_v52, %s1507_s4  ;;  %v1024_v42 = vmul.f32 %v1021_v0, %v1896_v55  ;;  %v997_v52 = vsel %vm249_vm3, %v995_v37, %v996_v34  ;;  %v1131_v37 = vstv %s1387_s2 }
 0x119   :  { %v1035_v4 = vrot.slane %v1023_v41, 2  ;;  %v1133_v41 = vmul.f32 %v1131_v37, %v1904_v59 }
 0x11c   :  { %947 = vrot.lane.b32.xlu1 %v940_v10, %s1507_s4  ;;  %945 = vrot.lane.b32.xlu0 %v938_v58, %s1507_s4 }
 0x11e   :  { %v316_v14 = vpop.permute.xlu1 %315  ;;  %v314_v63 = vpop.permute.xlu0 %313 }
 0x11f   :  { %v2035_v30 = vadd.f32 %v316_v14, %v1770_v45  ;;  %v2038_v50 = vadd.f32 %v314_v63, %v1776_v54  ;;  %v960_v45 = vmul.f32 %v957_v60, %v1874_v35  ;;  %v987_v54 = vmul.f32 %v982_v62, %v1854_v21 }
 0x120   :  { %968 = vrot.lane.b32.xlu1 %v959_v32, %s1508_s7  ;;  %966 = vrot.lane.b32.xlu0 %v958_v19, %s1508_s7  ;;  %v1037_v62 = vrot.slane %v1024_v42, 2  ;;  %v1026_v14 = vmul.f32 %v1021_v0, %v1854_v21  ;;  %v1034_v32 = vrot.slane %v1022_v56, 2  ;;  %v1027_v19 = vmul.f32 %v1021_v0, %v1863_v26 }
 0x121   :  { %v1001_v40 = vrot.slane %v987_v54, 1  ;;  %v1132_v42 = vmul.f32 %v1131_v37, %v1917_v57  ;;  %v1135_v56 = vmul.f32 %v1131_v37, %v1932_v1 }
 0x122   :  { %v2044_v28 = vpop.permute.xlu1 %414  ;;  %v2046_v17 = vpop.permute.xlu0 %412  ;;  %v1038_v29 = vsel %vm281_vm4, %v1035_v4, %v1037_v62  ;;  %v1042_v54 = vrot.slane %v1027_v19, 2  ;;  %v1161_v19 = vmul.f32 %v1156_v61, %v1932_v1 }
 0x123   :  { %v1004_v60 = vsel %vm249_vm3, %v1001_v40, %v1003_v51  ;;  %v1002_v63 = vsel %vm249_vm3, %v1000_v12, %v1001_v40  ;;  %v1157_v12 = vmul.f32 %v1156_v61, %v1917_v57 }
 0x124   :  { %972 = vrot.lane.b32.xlu1 %v961_v18, %s1508_s7  ;;  %970 = vrot.lane.b32.xlu0 %v960_v45, %s1508_s7  ;;  %v1036_v18 = vsel %vm281_vm4, %v1034_v32, %v1035_v4  ;;  %v1040_v45 = vrot.slane %v1026_v14, 2  ;;  %v1195_v4 = vstv %s1411_s6 }
 0x126   :  { %v2055_v13 = vpop.permute.xlu1 %418  ;;  %v2057_v9 = vpop.permute.xlu0 %416  ;;  %v1043_v34 = vsel %vm281_vm4, %v1040_v45, %v1042_v54  ;;  %v1041_v36 = vsel %vm281_vm4, %v1039_v25, %v1040_v45  ;;  %v1197_v45 = vmul.f32 %v1195_v4, %v1904_v59  ;;  %v1198_v54 = vmul.f32 %v1195_v4, %v1906_v2 }
 0x128   :  { %1007 = vrot.lane.b32.xlu1 %v999_v43, %s1508_s7  ;;  %1005 = vrot.lane.b32.xlu0 %v997_v52, %s1508_s7  ;;  %v1158_v43 = vmul.f32 %v1156_v61, %v1904_v59  ;;  %v1159_v52 = vmul.f32 %v1156_v61, %v1906_v2 }
 0x12a   :  { %v2066_v10 = vpop.permute.xlu1 %588  ;;  %v2068_v58 = vpop.permute.xlu0 %586  ;;  %v1172_v32 = vrot.slane %v1159_v52, 1 }
 0x12c   :  { %1011 = vrot.lane.b32.xlu1 %v1004_v60, %s1508_s7  ;;  %1009 = vrot.lane.b32.xlu0 %v1002_v63, %s1508_s7  ;;  %v1134_v60 = vmul.f32 %v1131_v37, %v1957_v38  ;;  %v1170_v63 = vrot.slane %v1158_v43, 1  ;;  %v1175_v37 = vrot.slane %v1161_v19, 1 }
 0x12e   :  { %v2077_v47 = vpop.permute.xlu1 %592  ;;  %v2079_v31 = vpop.permute.xlu0 %590 }
 0x130   :  { %1046 = vrot.lane.b32.xlu1 %v1038_v29, %s1508_s7  ;;  %1044 = vrot.lane.b32.xlu0 %v1036_v18, %s1508_s7  ;;  %v1169_v29 = vrot.slane %v1157_v12, 1  ;;  %v1160_v18 = vmul.f32 %v1156_v61, %v1957_v38  ;;  %v1177_v61 = vrot.slane %v1162_v5, 1  ;;  %v1201_v5 = vmul.f32 %v1195_v4, %v1939_v33 }
 0x132   :  { %v2085_v26 = vpop.permute.xlu1 %691  ;;  %v2087_v0 = vpop.permute.xlu0 %689  ;;  %v1171_v52 = vsel %vm249_vm3, %v1169_v29, %v1170_v63  ;;  %v1174_v12 = vrot.slane %v1160_v18, 1  ;;  %v1199_v29 = vmul.f32 %v1195_v4, %v1957_v38 }
 0x134   :  { %1050 = vrot.lane.b32.xlu1 %v1043_v34, %s1508_s7  ;;  %1048 = vrot.lane.b32.xlu0 %v1041_v36, %s1508_s7  ;;  %v1173_v36 = vsel %vm249_vm3, %v1170_v63, %v1172_v32  ;;  %v1234_v32 = vstv %s2106_s8  ;;  %v1200_v63 = vmul.f32 %v1195_v4, %v1932_v1 }
 0x136   :  { %v2093_v40 = vpop.permute.xlu1 %695  ;;  %v2095_v51 = vpop.permute.xlu0 %693 }
 0x138   :  { %1142 = vrot.lane.b32.xlu1 %v1133_v41, %s1507_s4  ;;  %1140 = vrot.lane.b32.xlu0 %v1132_v42, %s1507_s4  ;;  %v1196_v41 = vmul.f32 %v1195_v4, %v1917_v57 }
 0x13a   :  { %v2108_v62 = vpop.permute.xlu1 %865  ;;  %v2110_v14 = vpop.permute.xlu0 %863 }
 0x13b   :  { %2319 = vst [vmem:[#allocation25_spill] sm:$0xff] %v2108_v62  ;;  %2320 = vst [vmem:[#allocation26_spill] sm:$0xff] %v2110_v14 }
 0x13c   :  { %1146 = vrot.lane.b32.xlu1 %v1135_v56, %s1507_s4  ;;  %1144 = vrot.lane.b32.xlu0 %v1134_v60, %s1507_s4  ;;  %v1209_v56 = vrot.slane %v1197_v45, 2  ;;  %v1211_v60 = vrot.slane %v1198_v54, 2  ;;  %v1176_v45 = vsel %vm249_vm3, %v1174_v12, %v1175_v37  ;;  %v1208_v54 = vrot.slane %v1196_v41, 2 }
 0x13e   :  { %v351_v25 = vpop.permute.xlu1 %350  ;;  %v349_v34 = vpop.permute.xlu0 %348 }
 0x13f   :  { %v361_v42 = vadd.f32 %v351_v25, %v2022_v46  ;;  %v360_v43 = vadd.f32 %v349_v34, %v2012_v39  ;;  %v1178_v39 = vsel %vm249_vm3, %v1175_v37, %v1177_v61  ;;  %v2147_v34 = vstv %s2117_s9 }
 0x140   :  { %1181 = vrot.lane.b32.xlu1 %v1173_v36, %s1507_s4  ;;  %1179 = vrot.lane.b32.xlu0 %v1171_v52, %s1507_s4  ;;  %v1212_v36 = vsel %vm281_vm4, %v1209_v56, %v1211_v60  ;;  %v515_v61 = vstv %s2119_s10  ;;  %v1259_v52 = vstv %s2123_s11  ;;  %v1236_v37 = vmul.f32 %v1234_v32, %v1904_v59 }
 0x141   :  { %v1238_v60 = vmul.f32 %v1234_v32, %v1932_v1  ;;  %v2161_v49 = vmul.f32 %v1433_v27, %v515_v61  ;;  %v1263_v24 = vmul.f32 %v1259_v52, %v1957_v38 }
 0x142   :  { %v355_v19 = vpop.permute.xlu1 %354  ;;  %v353_v46 = vpop.permute.xlu0 %352 }
 0x143   :  { %v363_v18 = vadd.f32 %v355_v19, %v2035_v30  ;;  %v362_v25 = vadd.f32 %v353_v46, %v2038_v50  ;;  %v1214_v19 = vrot.slane %v1200_v63, 2  ;;  %v1216_v50 = vrot.slane %v1201_v5, 2 }
 0x144   :  { %1185 = vrot.lane.b32.xlu1 %v1178_v39, %s1507_s4  ;;  %1183 = vrot.lane.b32.xlu0 %v1176_v45, %s1507_s4  ;;  %v1213_v46 = vrot.slane %v1199_v29, 2  ;;  %v1210_v39 = vsel %vm281_vm4, %v1208_v54, %v1209_v56  ;;  %v1235_v45 = vmul.f32 %v1234_v32, %v1917_v57  ;;  %v518_v63 = vmul.f32 %v515_v61, %v1790_v15 }
 0x145   :  { %v2165_v5 = vstv %s2134_s13  ;;  %v1237_v56 = vmul.f32 %v1234_v32, %v1957_v38  ;;  %v2171_v29 = vmul.f32 %v1433_v27, %v2147_v34  ;;  %v1262_v32 = vmul.f32 %v1259_v52, %v1906_v2 }
 0x146   :  { %v390_v4 = vpop.permute.xlu1 %389  ;;  %v388_v30 = vpop.permute.xlu0 %387 }
 0x147   :  { %v400_v41 = vadd.f32 %v390_v4, %v361_v42  ;;  %v399_v12 = vadd.f32 %v388_v30, %v360_v43  ;;  %v1217_v4 = vsel %vm281_vm4, %v1214_v19, %v1216_v50  ;;  %v1215_v30 = vsel %vm281_vm4, %v1213_v46, %v1214_v19  ;;  %v1435_v46 = vld [vmem:[#allocation2 + $0x80] sm:$0xff] }
 0x148   :  { %1220 = vrot.lane.b32.xlu1 %v1212_v36, %s1507_s4  ;;  %1218 = vrot.lane.b32.xlu0 %v1210_v39, %s1507_s4  ;;  %v1434_v39 = vld [vmem:[#allocation2 + $0x18] sm:$0xff]  ;;  %v531_v50 = vrot.slane %v518_v63, 1  ;;  %v1260_v19 = vmul.f32 %v1259_v52, %v1917_v57  ;;  %v1265_v63 = vmul.f32 %v1259_v52, %v1939_v33 }
 0x149   :  { %v425_v42 = vadd.f32 %v2044_v28, %v400_v41  ;;  %v424_v43 = vadd.f32 %v2046_v17, %v399_v12  ;;  %v2176_v8 = vmul.f32 %v1434_v39, %v2147_v34  ;;  %v516_v53 = vmul.f32 %v1434_v39, %v515_v61 }
 0x14a   :  { %v394_v54 = vpop.permute.xlu1 %393  ;;  %v392_v36 = vpop.permute.xlu0 %391  ;;  %v1261_v17 = vmul.f32 %v1259_v52, %v1904_v59  ;;  %v529_v41 = vrot.slane %v2161_v49, 1  ;;  %v2185_v12 = vmul.f32 %v1435_v46, %v2147_v34  ;;  %v1264_v49 = vmul.f32 %v1259_v52, %v1932_v1 }
 0x14b   :  { %v402_v44 = vadd.f32 %v394_v54, %v363_v18  ;;  %v401_v28 = vadd.f32 %v392_v36, %v362_v25  ;;  %v520_v54 = vmul.f32 %v1435_v46, %v515_v61  ;;  %v521_v36 = vmul.f32 %v515_v61, %v1801_v20 }
 0x14c   :  { %1224 = vrot.lane.b32.xlu1 %v1217_v4, %s1507_s4  ;;  %1222 = vrot.lane.b32.xlu0 %v1215_v30, %s1507_s4  ;;  %v528_v6 = vrot.slane %v516_v53, 1  ;;  %v1436_v30 = vld [vmem:[#allocation2 + $0x78] sm:$0xff]  ;;  %v1273_v7 = vrot.slane %v1261_v17, 1  ;;  %v1278_v17 = vrot.slane %v1264_v49, 1  ;;  %s1382_s4 = sld [smem:[#allocation4 + $0x2]] }
 0x14d   :  { %v427_v18 = vadd.f32 %v2055_v13, %v402_v44  ;;  %v426_v25 = vadd.f32 %v2057_v9, %v401_v28  ;;  %v519_v14 = vmul.f32 %v1436_v30, %v515_v61  ;;  %v532_v44 = vsel %vm249_vm3, %v529_v41, %v531_v50 }
 0x14e   :  { %v454_v48 = vpop.permute.xlu1 %453  ;;  %v452_v4 = vpop.permute.xlu0 %451  ;;  %v1275_v13 = vrot.slane %v1262_v32, 1  ;;  %v1272_v9 = vrot.slane %v1260_v19, 1  ;;  %v509_v53 = vmul.f32 %v1436_v30, %v2147_v34  ;;  %v534_v61 = vrot.slane %v520_v54, 1 }
 0x14f   :  { %v464_v62 = vadd.f32 %v454_v48, %v425_v42  ;;  %v463_v16 = vadd.f32 %v452_v4, %v424_v43  ;;  %v536_v28 = vrot.slane %v521_v36, 1  ;;  %v549_v48 = vmul.f32 %v2153_v11, %v1790_v15 }
 0x150   :  { %1245 = vrot.lane.b32.xlu1 %v1236_v37, %s1508_s7  ;;  %1243 = vrot.lane.b32.xlu0 %v1235_v45, %s1508_s7  ;;  %v533_v52 = vrot.slane %v519_v14, 1  ;;  %v1280_v37 = vrot.slane %v1265_v63, 1  ;;  %v547_v45 = vmul.f32 %v1434_v39, %v2153_v11  ;;  %v1277_v32 = vrot.slane %v1263_v24, 1 }
 0x151   :  { %v1300_v34 = vmul.f32 %v2165_v5, %v1904_v59  ;;  %v530_v27 = vsel %vm249_vm3, %v528_v6, %v529_v41  ;;  %v1276_v15 = vsel %vm249_vm3, %v1273_v7, %v1275_v13  ;;  %v1301_v14 = vmul.f32 %v2165_v5, %v1906_v2 }
 0x152   :  { %v458_v42 = vpop.permute.xlu1 %457  ;;  %v456_v43 = vpop.permute.xlu0 %455  ;;  %v1274_v19 = vsel %vm249_vm3, %v1272_v9, %v1273_v7  ;;  %v537_v39 = vsel %vm249_vm3, %v534_v61, %v536_v28  ;;  %v562_v24 = vrot.slane %v549_v48, 2  ;;  %v535_v36 = vsel %vm249_vm3, %v533_v52, %v534_v61 }
 0x153   :  { %v466_v4 = vadd.f32 %v458_v42, %v427_v18  ;;  %v465_v50 = vadd.f32 %v456_v43, %v426_v25  ;;  %v560_v18 = vrot.slane %v548_v3, 2  ;;  %v1299_v6 = vmul.f32 %v2165_v5, %v1917_v57 }
 0x154   :  { %1249 = vrot.lane.b32.xlu1 %v1238_v60, %s1508_s7  ;;  %1247 = vrot.lane.b32.xlu0 %v1237_v56, %s1508_s7  ;;  %v1281_v60 = vsel %vm249_vm3, %v1278_v17, %v1280_v37  ;;  %v559_v56 = vrot.slane %v547_v45, 2  ;;  %v1279_v2 = vsel %vm249_vm3, %v1277_v32, %v1278_v17  ;;  %v1312_v63 = vrot.slane %v1300_v34, 2 }
 0x155   :  { %v1314_v3 = vrot.slane %v1301_v14, 2  ;;  %v551_v7 = vmul.f32 %v1435_v46, %v2153_v11  ;;  %v552_v13 = vmul.f32 %v2153_v11, %v1801_v20  ;;  %v550_v9 = vmul.f32 %v1436_v30, %v2153_v11 }
 0x156   :  { %v493_v25 = vpop.permute.xlu1 %492  ;;  %v491_v54 = vpop.permute.xlu0 %490  ;;  %v561_v28 = vsel %vm281_vm4, %v559_v56, %v560_v18  ;;  %v1311_v43 = vrot.slane %v1299_v6, 2  ;;  %v1303_v52 = vmul.f32 %v2165_v5, %v1932_v1  ;;  %v1304_v46 = vmul.f32 %v2165_v5, %v1939_v33 }
 0x157   :  { %v503_v41 = vadd.f32 %v493_v25, %v464_v62  ;;  %v502_v49 = vadd.f32 %v491_v54, %v463_v16  ;;  %v563_v16 = vsel %vm281_vm4, %v560_v18, %v562_v24  ;;  %v1302_v20 = vmul.f32 %v2165_v5, %v1957_v38 }
 0x158   :  { %1284 = vrot.lane.b32.xlu1 %v1276_v15, %s1508_s7  ;;  %1282 = vrot.lane.b32.xlu0 %v1274_v19, %s1508_s7  ;;  %v1315_v17 = vsel %vm281_vm4, %v1312_v63, %v1314_v3  ;;  %v565_v37 = vrot.slane %v551_v7, 2  ;;  %v567_v45 = vrot.slane %v552_v13, 2  ;;  %v564_v32 = vrot.slane %v550_v9, 2 }
 0x159   :  { %v512_v61 = vadd.f32 %v2171_v29, %v503_v41  ;;  %v511_v62 = vadd.f32 %v2176_v8, %v502_v49 }
 0x15a   :  { %v497_v48 = vpop.permute.xlu1 %496  ;;  %v495_v42 = vpop.permute.xlu0 %494 }
 0x15b   :  { %v543_v11 = vadd.f32 %v532_v44, %v512_v61  ;;  %v542_v29 = vadd.f32 %v530_v27, %v511_v62  ;;  %v505_v30 = vadd.f32 %v497_v48, %v466_v4  ;;  %v504_v8 = vadd.f32 %v495_v42, %v465_v50 }
 0x15c   :  { %1288 = vrot.lane.b32.xlu1 %v1281_v60, %s1508_s7  ;;  %1286 = vrot.lane.b32.xlu0 %v1279_v2, %s1508_s7  ;;  %v1313_v44 = vsel %vm281_vm4, %v1311_v43, %v1312_v63  ;;  %v1317_v4 = vrot.slane %v1303_v52, 2  ;;  %v1319_v50 = vrot.slane %v1304_v46, 2  ;;  %v1316_v27 = vrot.slane %v1302_v20, 2 }
 0x15d   :  { %v514_v34 = vadd.f32 %v2185_v12, %v505_v30  ;;  %v513_v15 = vadd.f32 %v509_v53, %v504_v8  ;;  %v574_v33 = vadd.f32 %v563_v16, %v543_v11  ;;  %v573_v14 = vadd.f32 %v561_v28, %v542_v29  ;;  %v1437_v29 = vld [vmem:[#allocation2 + $0x38] sm:$0xff] }
 0x15e   :  { %v628_v19 = vpop.permute.xlu1 %627  ;;  %v626_v5 = vpop.permute.xlu0 %625  ;;  %v568_v12 = vsel %vm281_vm4, %v565_v37, %v567_v45  ;;  %v566_v53 = vsel %vm281_vm4, %v564_v32, %v565_v37  ;;  %v794_v30 = vmul.f32 %v1437_v29, %v1857_v22  ;;  %v825_v8 = vmul.f32 %v1437_v29, %v1860_v23 }
 0x15f   :  { %v545_v18 = vadd.f32 %v537_v39, %v514_v34  ;;  %v544_v24 = vadd.f32 %v535_v36, %v513_v15  ;;  %v599_v25 = vadd.f32 %v2066_v10, %v574_v33  ;;  %v598_v54 = vadd.f32 %v2068_v58, %v573_v14 }
 0x160   :  { %1323 = vrot.lane.b32.xlu1 %v1315_v17, %s1508_s7  ;;  %1321 = vrot.lane.b32.xlu0 %v1313_v44, %s1508_s7  ;;  %v1320_v58 = vsel %vm281_vm4, %v1317_v4, %v1319_v50  ;;  %v1318_v36 = vsel %vm281_vm4, %v1316_v27, %v1317_v4  ;;  %v826_v17 = vmul.f32 %v1860_v23, %v1896_v55  ;;  %v837_v33 = vrot.slane %v825_v8, 2 }
 0x161   :  { %v638_v60 = vadd.f32 %v628_v19, %v599_v25  ;;  %v637_v56 = vadd.f32 %v626_v5, %v598_v54  ;;  %v576_v6 = vadd.f32 %v568_v12, %v545_v18  ;;  %v575_v41 = vadd.f32 %v566_v53, %v544_v24 }
 0x162   :  { %v632_v49 = vpop.permute.xlu1 %631  ;;  %v630_v2 = vpop.permute.xlu0 %629  ;;  %v839_v14 = vrot.slane %v826_v17, 2 }
 0x163   :  { %v601_v39 = vadd.f32 %v2077_v47, %v576_v6  ;;  %v600_v10 = vadd.f32 %v2079_v31, %v575_v41 }
 0x164   :  { %1327 = vrot.lane.b32.xlu1 %v1320_v58, %s1508_s7  ;;  %1325 = vrot.lane.b32.xlu0 %v1318_v36, %s1508_s7  ;;  %v840_v12 = vsel %vm281_vm4, %v837_v33, %v839_v14  ;;  %v2323_v58 = vld [vmem:[#allocation14_spill] sm:$0xff]  ;;  %v2324_v36 = vld [vmem:[#allocation16_spill] sm:$0xff]  ;;  %s1383_s7 = sld [smem:[#allocation4 + $0x3]] }
 0x165   :  { %v640_v63 = vadd.f32 %v632_v49, %v601_v39  ;;  %v639_v3 = vadd.f32 %v630_v2, %v600_v10  ;;  %v2321_v49 = vld [vmem:[#allocation13_spill] sm:$0xff]  ;;  %v2322_v39 = vld [vmem:[#allocation15_spill] sm:$0xff] }
 0x166   :  { %v667_v7 = vpop.permute.xlu1 %666  ;;  %v665_v13 = vpop.permute.xlu0 %664 }
 0x167   :  { %v677_v9 = vadd.f32 %v667_v7, %v638_v60  ;;  %v676_v61 = vadd.f32 %v665_v13, %v637_v56 }
 0x169   :  { %v702_v62 = vadd.f32 %v2085_v26, %v677_v9  ;;  %v701_v47 = vadd.f32 %v2087_v0, %v676_v61  ;;  %v795_v26 = vmul.f32 %v1857_v22, %v1896_v55  ;;  %v783_v0 = vstv %s1382_s4  ;;  %v1438_v61 = vld [vmem:[#allocation2 + $0x30] sm:$0xff] }
 0x16a   :  { %v671_v16 = vpop.permute.xlu1 %670  ;;  %v669_v31 = vpop.permute.xlu0 %668  ;;  %v785_v34 = vmul.f32 %v1437_v29, %v783_v0  ;;  %v787_v50 = vmul.f32 %v783_v0, %v1854_v21  ;;  %v786_v25 = vmul.f32 %v783_v0, %v1874_v35 }
 0x16b   :  { %v679_v28 = vadd.f32 %v671_v16, %v640_v63  ;;  %v678_v48 = vadd.f32 %v669_v31, %v639_v3  ;;  %v808_v45 = vrot.slane %v795_v26, 1 }
 0x16d   :  { %v704_v42 = vadd.f32 %v2093_v40, %v679_v28  ;;  %v703_v43 = vadd.f32 %v2095_v51, %v678_v48  ;;  %v806_v40 = vrot.slane %v794_v30, 1  ;;  %v784_v48 = vmul.f32 %v1438_v61, %v783_v0 }
 0x16e   :  { %v731_v52 = vpop.permute.xlu1 %730  ;;  %v729_v46 = vpop.permute.xlu0 %728 }
 0x16f   :  { %v741_v37 = vadd.f32 %v731_v52, %v702_v62  ;;  %v809_v4 = vsel %vm249_vm3, %v806_v40, %v808_v45  ;;  %v740_v9 = vadd.f32 %v729_v46, %v701_v47  ;;  %v793_v62 = vmul.f32 %v1438_v61, %v1857_v22  ;;  %v2325_v45 = vld [vmem:[#allocation25_spill] sm:$0xff] }
 0x172   :  { %v735_v20 = vpop.permute.xlu1 %734  ;;  %v733_v11 = vpop.permute.xlu0 %732 }
 0x173   :  { %v743_v19 = vadd.f32 %v735_v20, %v704_v42  ;;  %v742_v5 = vadd.f32 %v733_v11, %v703_v43  ;;  %v805_v42 = vrot.slane %v793_v62, 1  ;;  %v824_v43 = vmul.f32 %v1438_v61, %v1860_v23  ;;  %v2327_v61 = vld [vmem:[#allocation17_spill] sm:$0xff] }
 0x175   :  { %v807_v29 = vsel %vm249_vm3, %v805_v42, %v806_v40  ;;  %v836_v30 = vrot.slane %v824_v43, 2  ;;  %v2330_v43 = vld [vmem:[#allocation20_spill] sm:$0xff] }
 0x176   :  { %v770_v51 = vpop.permute.xlu1 %769  ;;  %v768_v32 = vpop.permute.xlu0 %767 }
 0x177   :  { %v780_v15 = vadd.f32 %v770_v51, %v741_v37  ;;  %v779_v16 = vadd.f32 %v768_v32, %v740_v9  ;;  %v838_v47 = vsel %vm281_vm4, %v836_v30, %v837_v33  ;;  %v2326_v51 = vld [vmem:[#allocation26_spill] sm:$0xff]  ;;  %v2332_v30 = vld [vmem:[#allocation23_spill] sm:$0xff] }
 0x179   :  { %v789_v44 = vadd.f32 %v785_v34, %v780_v15  ;;  %v788_v52 = vadd.f32 %v784_v48, %v779_v16  ;;  %v2329_v48 = vld [vmem:[#allocation18_spill] sm:$0xff] }
 0x17a   :  { %v774_v27 = vpop.permute.xlu1 %773  ;;  %v772_v18 = vpop.permute.xlu0 %771 }
 0x17b   :  { %v820_v24 = vadd.f32 %v809_v4, %v789_v44  ;;  %v782_v55 = vadd.f32 %v774_v27, %v743_v19  ;;  %v781_v54 = vadd.f32 %v772_v18, %v742_v5  ;;  %v819_v26 = vadd.f32 %v807_v29, %v788_v52  ;;  %v2331_v29 = vld [vmem:[#allocation21_spill] sm:$0xff] }
 0x17c   :  { %v1060_v27 = vstv %s1383_s7 }
 0x17d   :  { %v791_v53 = vadd.f32 %v787_v50, %v782_v55  ;;  %v790_v60 = vadd.f32 %v786_v25, %v781_v54  ;;  %v851_v56 = vadd.f32 %v840_v12, %v820_v24  ;;  %v850_v46 = vadd.f32 %v838_v47, %v819_v26 }
 0x17e   :  { %v870_v6 = vpop.permute.xlu1 %869  ;;  %v868_v41 = vpop.permute.xlu0 %867 }
 0x17f   :  { %v822_v2 = vadd.f32 %v2321_v49, %v791_v53  ;;  %v821_v10 = vadd.f32 %v2322_v39, %v790_v60  ;;  %v876_v0 = vadd.f32 %v2325_v45, %v851_v56  ;;  %v875_v32 = vadd.f32 %v2326_v51, %v850_v46 }
 0x180   :  { %v1062_v60 = vmul.f32 %v1060_v27, %v1904_v59  ;;  %v1061_v49 = vmul.f32 %v1060_v27, %v1917_v57  ;;  %v2328_v57 = vld [vmem:[#allocation19_spill] sm:$0xff] }
 0x181   :  { %v853_v21 = vadd.f32 %v2323_v58, %v822_v2  ;;  %v852_v63 = vadd.f32 %v2324_v36, %v821_v10 }
 0x182   :  { %v905_v3 = vpop.permute.xlu1 %904  ;;  %v903_v7 = vpop.permute.xlu0 %902 }
 0x183   :  { %v915_v15 = vadd.f32 %v905_v3, %v876_v0  ;;  %v914_v14 = vadd.f32 %v903_v7, %v875_v32  ;;  %v878_v19 = vadd.f32 %v870_v6, %v853_v21  ;;  %v877_v40 = vadd.f32 %v868_v41, %v852_v63 }
 0x184   :  { %v1064_v3 = vmul.f32 %v1060_v27, %v1932_v1 }
 0x186   :  { %v909_v13 = vpop.permute.xlu1 %908  ;;  %v907_v35 = vpop.permute.xlu0 %906 }
 0x187   :  { %v917_v33 = vadd.f32 %v909_v13, %v878_v19  ;;  %v916_v18 = vadd.f32 %v907_v35, %v877_v40  ;;  %v1063_v13 = vmul.f32 %v1060_v27, %v1957_v38  ;;  %v2333_v38 = vld [vmem:[#allocation22_spill] sm:$0xff] }
 0x18a   :  { %v944_v31 = vpop.permute.xlu1 %943  ;;  %v942_v28 = vpop.permute.xlu0 %941 }
 0x18b   :  { %v954_v5 = vadd.f32 %v944_v31, %v915_v15  ;;  %v953_v44 = vadd.f32 %v942_v28, %v914_v14 }
 0x18e   :  { %v948_v20 = vpop.permute.xlu1 %947  ;;  %v946_v11 = vpop.permute.xlu0 %945 }
 0x18f   :  { %v956_v25 = vadd.f32 %v948_v20, %v917_v33  ;;  %v955_v54 = vadd.f32 %v946_v11, %v916_v18 }
 0x192   :  { %v969_v8 = vpop.permute.xlu1 %968  ;;  %v967_v17 = vpop.permute.xlu0 %966 }
 0x193   :  { %v979_v24 = vadd.f32 %v969_v8, %v954_v5  ;;  %v978_v55 = vadd.f32 %v967_v17, %v953_v44  ;;  %v2334_v17 = vld [vmem:[#allocation24_spill] sm:$0xff] }
 0x196   :  { %v973_v22 = vpop.permute.xlu1 %972  ;;  %v971_v37 = vpop.permute.xlu0 %970 }
 0x197   :  { %v981_v41 = vadd.f32 %v973_v22, %v956_v25  ;;  %v980_v2 = vadd.f32 %v971_v37, %v955_v54 }
 0x19a   :  { %v1008_v23 = vpop.permute.xlu1 %1007  ;;  %v1006_v34 = vpop.permute.xlu0 %1005 }
 0x19b   :  { %v1018_v12 = vadd.f32 %v1008_v23, %v979_v24  ;;  %v1017_v53 = vadd.f32 %v1006_v34, %v978_v55 }
 0x19e   :  { %v1012_v4 = vpop.permute.xlu1 %1011  ;;  %v1010_v50 = vpop.permute.xlu0 %1009 }
 0x19f   :  { %v1020_v58 = vadd.f32 %v1012_v4, %v981_v41  ;;  %v1019_v21 = vadd.f32 %v1010_v50, %v980_v2 }
 0x1a2   :  { %v1047_v56 = vpop.permute.xlu1 %1046  ;;  %v1045_v6 = vpop.permute.xlu0 %1044 }
 0x1a3   :  { %v1057_v39 = vadd.f32 %v1047_v56, %v1018_v12  ;;  %v1056_v10 = vadd.f32 %v1045_v6, %v1017_v53 }
 0x1a5   :  { %v1066_v36 = vadd.f32 %v1062_v60, %v1057_v39  ;;  %v1065_v63 = vadd.f32 %v1061_v49, %v1056_v10 }
 0x1a6   :  { %v1051_v7 = vpop.permute.xlu1 %1050  ;;  %v1049_v35 = vpop.permute.xlu0 %1048 }
 0x1a7   :  { %v1059_v9 = vadd.f32 %v1051_v7, %v1020_v58  ;;  %v1058_v59 = vadd.f32 %v1049_v35, %v1019_v21  ;;  %v1097_v62 = vadd.f32 %v2327_v61, %v1066_v36  ;;  %v1096_v16 = vadd.f32 %v2328_v57, %v1065_v63 }
 0x1a8   :  { %v1337_v58 = vstv %s2304_s1  ;;  %s1509_s1 = smov [#allocation9]  }
 0x1a9   :  { %v1068_v31 = vadd.f32 %v1064_v3, %v1059_v9  ;;  %v1067_v28 = vadd.f32 %v1063_v13, %v1058_v59  ;;  %v1128_v42 = vadd.f32 %v2329_v48, %v1097_v62  ;;  %v1127_v52 = vadd.f32 %v2330_v43, %v1096_v16  ;;  %s1368_s16 = sshll.u32 %s1509_s1, 4  ;;  %s1369_s16 = int_to_ptr.vmem [resolvable:$true] %s1368_s16 }
 0x1aa   :  { %v1143_v20 = vpop.permute.xlu1 %1142  ;;  %v1141_v11 = vpop.permute.xlu0 %1140  ;;  %s1473_s17 = scalar_lea.vmem %s1369_s16, 512  ;;  %p1478_p0 = scmp.lt.s32.totalorder %s1369_s16, %s1369_s16 }
 0x1ab   :  { %v1099_v1 = vadd.f32 %v2331_v29, %v1068_v31  ;;  %v1098_v26 = vadd.f32 %v2332_v30, %v1067_v28  ;;  %v1153_v44 = vadd.f32 %v1143_v20, %v1128_v42  ;;  %v1152_v4 = vadd.f32 %v1141_v11, %v1127_v52  ;;  %p1474_p13 = scmp.ne.s32.totalorder %s1369_s16, %s1473_s17  ;;  %p1479_p1 = scmp.lt.s32.totalorder %s1473_s17, %s1473_s17 }
 0x1ad   :  { %v1130_v8 = vadd.f32 %v2333_v38, %v1099_v1  ;;  %v1129_v47 = vadd.f32 %v2334_v17, %v1098_v26  ;;  %p1480_p2 = por %p1479_p1, %p1478_p0 }
 0x1ae   :  { %v1147_v46 = vpop.permute.xlu1 %1146  ;;  %v1145_v22 = vpop.permute.xlu0 %1144 }
 0x1af   :  { %v1155_v24 = vadd.f32 %v1147_v46, %v1130_v8  ;;  %v1154_v55 = vadd.f32 %v1145_v22, %v1129_v47  ;;  %p1481_p3 = pnand %p1480_p2, %p1474_p13 }
 0x1b2   :  { %v1182_v37 = vpop.permute.xlu1 %1181  ;;  %v1180_v45 = vpop.permute.xlu0 %1179 }
 0x1b3   :  { %v1192_v33 = vadd.f32 %v1182_v37, %v1153_v44  ;;  %v1191_v18 = vadd.f32 %v1180_v45, %v1152_v4 }
 0x1b6   :  { %v1186_v0 = vpop.permute.xlu1 %1185  ;;  %v1184_v51 = vpop.permute.xlu0 %1183 }
 0x1b7   :  { %v1194_v60 = vadd.f32 %v1186_v0, %v1155_v24  ;;  %v1193_v56 = vadd.f32 %v1184_v51, %v1154_v55 }
 0x1ba   :  { %v1221_v32 = vpop.permute.xlu1 %1220  ;;  %v1219_v23 = vpop.permute.xlu0 %1218 }
 0x1bb   :  { %v1231_v25 = vadd.f32 %v1221_v32, %v1192_v33  ;;  %v1230_v54 = vadd.f32 %v1219_v23, %v1191_v18 }
 0x1be   :  { %v1225_v34 = vpop.permute.xlu1 %1224  ;;  %v1223_v15 = vpop.permute.xlu0 %1222 }
 0x1bf   :  { %v1233_v41 = vadd.f32 %v1225_v34, %v1194_v60  ;;  %v1232_v2 = vadd.f32 %v1223_v15, %v1193_v56 }
 0x1c2   :  { %v1246_v14 = vpop.permute.xlu1 %1245  ;;  %v1244_v19 = vpop.permute.xlu0 %1243 }
 0x1c3   :  { %v1256_v49 = vadd.f32 %v1246_v14, %v1231_v25  ;;  %v1255_v6 = vadd.f32 %v1244_v19, %v1230_v54 }
 0x1c6   :  { %v1250_v40 = vpop.permute.xlu1 %1249  ;;  %v1248_v5 = vpop.permute.xlu0 %1247 }
 0x1c7   :  { %v1258_v63 = vadd.f32 %v1250_v40, %v1233_v41  ;;  %v1257_v3 = vadd.f32 %v1248_v5, %v1232_v2 }
 0x1ca   :  { %v1285_v50 = vpop.permute.xlu1 %1284  ;;  %v1283_v27 = vpop.permute.xlu0 %1282 }
 0x1cb   :  { %v1295_v39 = vadd.f32 %v1285_v50, %v1256_v49  ;;  %v1294_v10 = vadd.f32 %v1283_v27, %v1255_v6 }
 0x1ce   :  { %v1289_v12 = vpop.permute.xlu1 %1288  ;;  %v1287_v53 = vpop.permute.xlu0 %1286 }
 0x1cf   :  { %v1297_v35 = vadd.f32 %v1289_v12, %v1258_v63  ;;  %v1296_v9 = vadd.f32 %v1287_v53, %v1257_v3 }
 0x1d2   :  { %v1324_v21 = vpop.permute.xlu1 %1323  ;;  %v1322_v36 = vpop.permute.xlu0 %1321 }
 0x1d3   :  { %v1334_v7 = vadd.f32 %v1324_v21, %v1295_v39  ;;  %v1333_v13 = vadd.f32 %v1322_v36, %v1294_v10 }
 0x1d5   :  { %v1339_v59 = vadd.f32 %v1337_v58, %v1334_v7  ;;  %v1338_v61 = vadd.f32 %v1337_v58, %v1333_v13 }
 0x1d6   :  { %v1328_v62 = vpop.permute.xlu1 %1327  ;;  %v1326_v57 = vpop.permute.xlu0 %1325 }
 0x1d7   :  { %v1343_v16 = vmul.f32 0.5, %v1339_v59  ;;  %v1342_v31 = vmul.f32 0.5, %v1338_v61  ;;  %v1336_v28 = vadd.f32 %v1328_v62, %v1297_v35  ;;  %v1335_v48 = vadd.f32 %v1326_v57, %v1296_v9 }
 0x1d9   :  { %1425 = vtanh.f32 %v1343_v16  ;;  %v1341_v42 = vadd.f32 %v1337_v58, %v1336_v28  ;;  %v1340_v43 = vadd.f32 %v1337_v58, %v1335_v48 }
 0x1da   :  { %1427 = vtanh.f32 %v1342_v31 }
 0x1db   :  { %v1345_v52 = vmul.f32 0.5, %v1341_v42  ;;  %v1344_v20 = vmul.f32 0.5, %v1340_v43 }
 0x1dd   :  { %1429 = vtanh.f32 %v1345_v52 }
 0x1de   :  { %1431 = vtanh.f32 %v1344_v20 }
 0x1e3   :  { %v1426_v11 = vpop.eup %1425 }
 0x1e4   :  { %v1428_v29 = vpop.eup %1427  ;;  %v1351_v1 = vadd.f32 1.0, %v1426_v11 }
 0x1e5   :  { %v1350_v30 = vadd.f32 1.0, %v1428_v29 }
 0x1e6   :  { %v1355_v26 = vmul.f32 0.5, %v1351_v1 }
 0x1e7   :  { %v1430_v38 = vpop.eup %1429  ;;  %v1354_v8 = vmul.f32 0.5, %v1350_v30 }
 0x1e8   :  { %v1432_v17 = vpop.eup %1431  ;;  %v1353_v47 = vadd.f32 1.0, %v1430_v38  ;;  %1360 = vst.msk [vmem:[#allocation9 + $0x8] sm:$0xff] %vm1358_vm5, %v1355_v26 }
 0x1e9   :  { %v1352_v46 = vadd.f32 1.0, %v1432_v17  ;;  %1359 = vst.msk [vmem:[#allocation9] sm:$0xff] %vm1358_vm5, %v1354_v8 }
 0x1ea   :  { %v1357_v22 = vmul.f32 0.5, %v1353_v47 }
 0x1eb   :  { %v1356_v37 = vmul.f32 0.5, %v1352_v46 }
 0x1ec   :  { %1362 = vst.msk [vmem:[#allocation9 + $0x18] sm:$0xff] %vm1358_vm5, %v1357_v22 }
 0x1ed   :  { %1361 = vst.msk [vmem:[#allocation9 + $0x10] sm:$0xff] %vm1358_vm5, %v1356_v37 }
 0x1ee   :  { %1484 = shalt.err (!%p1481_p3)
}
 0x1ef   :  { %s1485_s20 = scalar_lea.hbm %s2306_s3, 512 }
 0x1f0   :  { %p1486_p4 = scmp.ne.s32.totalorder %s2306_s3, %s1485_s20  ;;  %p1489_p5 = scmp.lt.u32.totalorder %s1485_s20, %s2306_s3 }
 0x1f2   :  { %p1491_p6 = pnand %p1489_p5, %p1486_p4 }
 0x1f4   :  { %1494 = shalt.err (!%p1491_p6)
}
 0x1f5   :  { %1374 = dma.vmem_to_hbm [thread:$0]  %s1369_s16, 512, %s2306_s3, [#allocation6], %s1503_s26, %s1503_s26, %s1504_s27  }
 0x1f6   :  { %1499 = dma.done.wait [#allocation6], 512  }
 0x1f7   :  { %1500 = vsyncadd [#allocation6], 4294966784 }
 0x1f8   :  { %1378 = vsyncpa [#allocation5], 1 }
 0x1f9   :  { %1379 = vsyncpa [#allocation6], 1 }
 0x1fa   :  { %1380 = vsyncpa [#allocation7], 1 }

</bundles_post_ra>
